<compile_context>
chip_gen: v7x
topology: tpu7x:2x2x1
jax: 0.10.0
libtpu: 0.0.40
codegen_flags: <defaults>
</compile_context>

<pallas_src>
import jax
import jax.numpy as jnp
from jax.experimental import pallas as pl
from jax.experimental.pallas import tpu as pltpu


def _round_up(x, m):
    return ((x + m - 1) // m) * m


def _num_tensorcores():
    """2 TensorCores per chip on v7x, 1 on v5e/v6e (safe fallback = 1)."""
    try:
        kind = jax.devices()[0].device_kind.lower()
    except Exception:
        return 1
    return 2 if ("v7" in kind or "7x" in kind) else 1


def _pick_tile_rows(B, num_tc):
    """Batch-tile rows for the grid path.

    >=256 rows/tile amortizes the ~0.35us grid-step overhead and per-layer MXU
    fill/drain; 512 caps VMEM (512x1024 f32 intermediate = 2 MiB).  On v7x we
    shrink the tile so at least `num_tc` parallel tiles exist.
    """
    per_core = -(-B // num_tc)  # cdiv
    return max(128, min(512, _round_up(per_core, 128)))


# ------------------------------------------------------------------------------
# Raw (PyTorch-style) parameter construction, matching WN_Linear.reset_parameters
# ------------------------------------------------------------------------------
def init_wn_linear_params(key, in_f, out_f):
    """weight ~ N(0, 0.1), bias = 0, weight_scale = 1 (PyTorch (out_f, in_f) layout)."""
    w = 0.1 * jax.random.normal(key, (out_f, in_f), dtype=jnp.float32)
    b = jnp.zeros((out_f,), dtype=jnp.float32)
    ws = jnp.ones((out_f,), dtype=jnp.float32)
    return {"w": w, "b": b, "ws": ws}


def build_wn_classifier_raw_params(key, input_size, feature_size, num_label):
    layer_dims = [
        (input_size, 1000),
        (1000, 500),
        (500, 250),
        (250, 250),
        (250, feature_size),
        (feature_size, num_label),  # out_class head (train_scale=True -> ones at init)
    ]
    keys = jax.random.split(key, len(layer_dims))
    return [init_wn_linear_params(k, i, o) for k, (i, o) in zip(keys, layer_dims)]


# ------------------------------------------------------------------------------
# One-time parameter preparation: fold weight-norm, transpose, pad, cast to bf16
# ------------------------------------------------------------------------------
def prepare_wn_classifier_params(raw_params):
    prepped = []
    for p in raw_params:
        w = p["w"].astype(jnp.float32)                       # (out_f, in_f)
        out_f, in_f = w.shape
        # eps INSIDE the sqrt, exactly as the PyTorch module: sqrt(sum(w^2)+1e-6)
        inv_norm = jax.lax.rsqrt(jnp.sum(w * w, axis=1, keepdims=True) + 1e-6)
        w_n = (w * (p["ws"].astype(jnp.float32)[:, None] * inv_norm)).T  # (in_f, out_f)

        in_p = _round_up(in_f, 128)
        out_p = _round_up(out_f, 128)
        w_pad = jnp.zeros((in_p, out_p), jnp.bfloat16)
        w_pad = w_pad.at[:in_f, :out_f].set(w_n.astype(jnp.bfloat16))
        b_pad = jnp.zeros((1, out_p), jnp.float32)
        b_pad = b_pad.at[0, :out_f].set(p["b"].astype(jnp.float32))
        prepped.append({"w": w_pad, "b": b_pad, "in_f": in_f, "out_f": out_f})
    return prepped


# ------------------------------------------------------------------------------
# Fused kernel: chain all layers with weights resident in VMEM
# ------------------------------------------------------------------------------
def _make_fused_kernel(relu_flags):
    n = len(relu_flags)

    def kernel(*refs):
        x_ref = refs[0]
        o_ref = refs[-1]
        h = x_ref[...]                                       # (TB, in_pad) bf16
        for li in range(n):
            w_ref = refs[1 + 2 * li]                         # (in_pad, out_pad) bf16
            b_ref = refs[2 + 2 * li]                         # (1, out_pad)      f32
            # bf16 operands on the MXU, f32 accumulation; bias/ReLU in f32 (VPU)
            y = jnp.dot(h.astype(jnp.bfloat16), w_ref[...],
                        preferred_element_type=jnp.float32)
            y = y + b_ref[...]
            if relu_flags[li]:
                y = jnp.maximum(y, 0.0)
            h = y
        o_ref[...] = h.astype(o_ref.dtype)                   # bf16 lane-dense store

    return kernel


def wn_classifier_forward(prepped, X, require="class"):
    """Forward pass of WN_Classifier (eval mode: GaussianNoise is identity)."""
    if X.ndim == 4:
        X = X.reshape(X.shape[0], -1)                        # NCHW -> (N, C*H*W)
    B, in_f = X.shape

    num_layers = 5 if require == "feat" else 6
    relu_flags = tuple([True] * 5 + [False] * (num_layers - 5))
    layers = prepped[:num_layers]
    assert layers[0]["in_f"] == in_f, (layers[0]["in_f"], in_f)

    in_pad = layers[0]["w"].shape[0]
    out_pad = layers[-1]["w"].shape[1]
    out_f = layers[-1]["out_f"]

    kernel = _make_fused_kernel(relu_flags)
    flat = [a for lp in layers for a in (lp["w"], lp["b"])]

    # bf16 input: halves HBM->VMEM DMA bytes for the only per-row input.
    Xb = X.astype(jnp.bfloat16)
    if in_pad != in_f:                                       # not needed for 256-dim input
        Xb = jnp.pad(Xb, ((0, 0), (0, in_pad - in_f)))

    num_tc = _num_tensorcores()

    flops = int(2 * B * sum(lp["in_f"] * lp["out_f"] for lp in layers))
    bytes_accessed = int(
        B * (in_pad + out_pad) * 2
        + sum(int(lp["w"].size) * 2 + int(lp["b"].size) * 4 for lp in layers))
    cost = pl.CostEstimate(flops=flops, transcendentals=0,
                           bytes_accessed=bytes_accessed)

    # On 1-TC chips (v5e/v6e) small batches run gridless; on v7x push mid-size
    # batches (>128) onto a multi-tile "parallel" grid to use both TensorCores.
    gridless_max = 256 // num_tc

    if B <= gridless_max:
        # Whole batch in one VMEM-resident block: no grid, no per-step bookkeeping.
        B_pad = _round_up(B, 16)                             # bf16 sublane pack
        Xp = Xb if B_pad == B else jnp.pad(Xb, ((0, B_pad - B), (0, 0)))
        vmem = pl.BlockSpec(memory_space=pltpu.MemorySpace.VMEM)
        out = pl.pallas_call(
            kernel,
            out_shape=jax.ShapeDtypeStruct((B_pad, out_pad), jnp.bfloat16),
            in_specs=[vmem] * (1 + len(flat)),
            out_specs=vmem,
            compiler_params=pltpu.CompilerParams(vmem_limit_bytes=32 << 20),
            cost_estimate=cost,
        )(Xp, *flat)
    else:
        # Batch-tiled grid: weights invariant across the batch axis (no re-DMA),
        # "parallel" lets v7x shard batch tiles across its two TensorCores.
        # No host-side batch pad: partial trailing block is handled by Pallas;
        # junk rows are row-local and sliced off below.
        TB = _pick_tile_rows(B, num_tc)
        in_specs = [pl.BlockSpec((TB, in_pad), lambda i: (i, 0))]
        for lp in layers:
            ip, op = lp["w"].shape
            in_specs.append(pl.BlockSpec((ip, op), lambda i: (0, 0)))
            in_specs.append(pl.BlockSpec((1, op), lambda i: (0, 0)))

        out = pl.pallas_call(
            kernel,
            out_shape=jax.ShapeDtypeStruct((B, out_pad), jnp.bfloat16),
            grid=(pl.cdiv(B, TB),),
            in_specs=in_specs,
            out_specs=pl.BlockSpec((TB, out_pad), lambda i: (i, 0)),
            compiler_params=pltpu.CompilerParams(
                dimension_semantics=("parallel",),
                vmem_limit_bytes=32 << 20,
            ),
            cost_estimate=cost,
        )(Xb, *flat)

    # Tiny slice/cast outside the kernel (B x 10 or B x 64 elements).
    return out[:B, :out_f].astype(jnp.float32)


# ------------------------------------------------------------------------------
# References for numerical checking
# ------------------------------------------------------------------------------
def wn_classifier_forward_ref_f32(raw_params, X, require="class"):
    """Pure-JAX f32 reference with the original (un-folded) weight-norm math."""
    if X.ndim == 4:
        X = X.reshape(X.shape[0], -1)
    h = X.astype(jnp.float32)

    def layer(h, p, relu):
        w = p["w"].astype(jnp.float32)
        norm_w = w * (p["ws"][:, None] / jnp.sqrt(jnp.sum(w * w, axis=1, keepdims=True) + 1e-6))
        y = h @ norm_w.T + p["b"][None, :]
        return jnp.maximum(y, 0.0) if relu else y

    for p in raw_params[:5]:
        h = layer(h, p, True)
    if require == "feat":
        return h
    return layer(h, raw_params[5], False)


def wn_classifier_forward_ref_matched(prepped, X, require="class"):
    """Reference matching the kernel's precision (folded/padded bf16 matmuls,
    f32 accumulation, bf16 output store)."""
    if X.ndim == 4:
        X = X.reshape(X.shape[0], -1)
    num_layers = 5 if require == "feat" else 6
    relu_flags = [True] * 5 + [False] * (num_layers - 5)
    layers = prepped[:num_layers]
    in_f = X.shape[1]
    in_pad = layers[0]["w"].shape[0]
    h = jnp.pad(X.astype(jnp.float32), ((0, 0), (0, in_pad - in_f)))
    for lp, relu in zip(layers, relu_flags):
        y = jnp.dot(h.astype(jnp.bfloat16), lp["w"], preferred_element_type=jnp.float32)
        y = y + lp["b"]
        if relu:
            y = jnp.maximum(y, 0.0)
        h = y
    h = h.astype(jnp.bfloat16).astype(jnp.float32)   # mirror kernel's bf16 writeback
    return h[:, : layers[-1]["out_f"]]


if __name__ == "__main__":
    # Shapes consistent with the module: args.image_size=16, args.num_label=10,
    # feature_size=64, batch=2, C=1 MNIST-like NCHW input.
    image_size = 16
    num_label = 10
    feature_size = 64
    batch = 2
    input_size = image_size * image_size

    key = jax.random.PRNGKey(0)
    k_params, k_x, k_x2 = jax.random.split(key, 3)

    raw_params = build_wn_classifier_raw_params(k_params, input_size, feature_size, num_label)
    prepped = prepare_wn_classifier_params(raw_params)

    x = jax.random.normal(k_x, (batch, 1, image_size, image_size), dtype=jnp.float32)

    # class head: fused 6-layer kernel, gridless single-block path
    out = jax.block_until_ready(wn_classifier_forward(prepped, x, require="class"))
    assert out.shape == (batch, num_label), out.shape
    ref_m = wn_classifier_forward_ref_matched(prepped, x, require="class")
    assert jnp.allclose(out, ref_m, atol=2e-2, rtol=2e-2), "mismatch vs matched-precision reference"
    ref_f32 = wn_classifier_forward_ref_f32(raw_params, x, require="class")
    assert jnp.allclose(out, ref_f32, atol=6e-2, rtol=6e-2), "mismatch vs f32 reference"

    # feat branch: fused 5-layer kernel
    feat = jax.block_until_ready(wn_classifier_forward(prepped, x, require="feat"))
    assert feat.shape == (batch, feature_size), feat.shape
    ref_feat = wn_classifier_forward_ref_matched(prepped, x, require="feat")
    assert jnp.allclose(feat, ref_feat, atol=2e-2, rtol=2e-2), "feat mismatch"

    # larger batch exercises the batch-tiled ("parallel") grid path with a
    # partial trailing block (no host-side batch padding)
    big_b = 300
    x_big = jax.random.normal(k_x2, (big_b, 1, image_size, image_size), dtype=jnp.float32)
    out_big = jax.block_until_ready(wn_classifier_forward(prepped, x_big, require="class"))
    assert out_big.shape == (big_b, num_label), out_big.shape
    ref_big = wn_classifier_forward_ref_matched(prepped, x_big, require="class")
    assert jnp.allclose(out_big, ref_big, atol=2e-2, rtol=2e-2), "big-batch mismatch"

    print("KERNEL_OK")
</pallas_src>

<mosaic_0001>
module attributes {stable_mosaic.version = 11 : i64} {
  func.func @kernel(%arg0: memref<16x256xbf16, #tpu.memory_space<vmem>>, %arg1: memref<256x1024xbf16, #tpu.memory_space<vmem>>, %arg2: memref<1x1024xf32, #tpu.memory_space<vmem>>, %arg3: memref<1024x512xbf16, #tpu.memory_space<vmem>>, %arg4: memref<1x512xf32, #tpu.memory_space<vmem>>, %arg5: memref<512x256xbf16, #tpu.memory_space<vmem>>, %arg6: memref<1x256xf32, #tpu.memory_space<vmem>>, %arg7: memref<256x256xbf16, #tpu.memory_space<vmem>>, %arg8: memref<1x256xf32, #tpu.memory_space<vmem>>, %arg9: memref<256x128xbf16, #tpu.memory_space<vmem>>, %arg10: memref<1x128xf32, #tpu.memory_space<vmem>>, %arg11: memref<128x128xbf16, #tpu.memory_space<vmem>>, %arg12: memref<1x128xf32, #tpu.memory_space<vmem>>, %arg13: memref<16x128xbf16, #tpu.memory_space<vmem>>) attributes {dimension_semantics = [], scalar_prefetch = 0 : i64, scratch_operands = 0 : i64, tpu.core_type = #tpu.core_type<tc>} {
    %c0 = arith.constant 0 : index
    %c0_0 = arith.constant 0 : index
    %0 = vector.load %arg0[%c0, %c0_0] : memref<16x256xbf16, #tpu.memory_space<vmem>>, vector<16x256xbf16>
    %c0_1 = arith.constant 0 : index
    %c0_2 = arith.constant 0 : index
    %1 = vector.load %arg1[%c0_1, %c0_2] : memref<256x1024xbf16, #tpu.memory_space<vmem>>, vector<256x1024xbf16>
    %cst = arith.constant dense<0.000000e+00> : vector<16x1024xf32>
    %2 = tpu.matmul %0, %1, %cst {dimension_numbers = #tpu.dot_dimension_numbers<[1], [0], [0], [1], [0, 0, 1, 1], [], []>} : vector<16x256xbf16>, vector<256x1024xbf16>, vector<16x1024xf32> -> vector<16x1024xf32>
    %c0_3 = arith.constant 0 : index
    %c0_4 = arith.constant 0 : index
    %3 = vector.load %arg2[%c0_3, %c0_4] : memref<1x1024xf32, #tpu.memory_space<vmem>>, vector<1x1024xf32>
    %4 = vector.broadcast %3 : vector<1x1024xf32> to vector<16x1024xf32>
    %5 = arith.addf %2, %4 : vector<16x1024xf32>
    %cst_5 = arith.constant 0.000000e+00 : f32
    %6 = vector.broadcast %cst_5 : f32 to vector<16x1024xf32>
    %7 = arith.maximumf %5, %6 : vector<16x1024xf32>
    %8 = arith.truncf %7 : vector<16x1024xf32> to vector<16x1024xbf16>
    %c0_6 = arith.constant 0 : index
    %c0_7 = arith.constant 0 : index
    %9 = vector.load %arg3[%c0_6, %c0_7] : memref<1024x512xbf16, #tpu.memory_space<vmem>>, vector<1024x512xbf16>
    %cst_8 = arith.constant dense<0.000000e+00> : vector<16x512xf32>
    %10 = tpu.matmul %8, %9, %cst_8 {dimension_numbers = #tpu.dot_dimension_numbers<[1], [0], [0], [1], [0, 0, 1, 1], [], []>} : vector<16x1024xbf16>, vector<1024x512xbf16>, vector<16x512xf32> -> vector<16x512xf32>
    %c0_9 = arith.constant 0 : index
    %c0_10 = arith.constant 0 : index
    %11 = vector.load %arg4[%c0_9, %c0_10] : memref<1x512xf32, #tpu.memory_space<vmem>>, vector<1x512xf32>
    %12 = vector.broadcast %11 : vector<1x512xf32> to vector<16x512xf32>
    %13 = arith.addf %10, %12 : vector<16x512xf32>
    %cst_11 = arith.constant 0.000000e+00 : f32
    %14 = vector.broadcast %cst_11 : f32 to vector<16x512xf32>
    %15 = arith.maximumf %13, %14 : vector<16x512xf32>
    %16 = arith.truncf %15 : vector<16x512xf32> to vector<16x512xbf16>
    %c0_12 = arith.constant 0 : index
    %c0_13 = arith.constant 0 : index
    %17 = vector.load %arg5[%c0_12, %c0_13] : memref<512x256xbf16, #tpu.memory_space<vmem>>, vector<512x256xbf16>
    %cst_14 = arith.constant dense<0.000000e+00> : vector<16x256xf32>
    %18 = tpu.matmul %16, %17, %cst_14 {dimension_numbers = #tpu.dot_dimension_numbers<[1], [0], [0], [1], [0, 0, 1, 1], [], []>} : vector<16x512xbf16>, vector<512x256xbf16>, vector<16x256xf32> -> vector<16x256xf32>
    %c0_15 = arith.constant 0 : index
    %c0_16 = arith.constant 0 : index
    %19 = vector.load %arg6[%c0_15, %c0_16] : memref<1x256xf32, #tpu.memory_space<vmem>>, vector<1x256xf32>
    %20 = vector.broadcast %19 : vector<1x256xf32> to vector<16x256xf32>
    %21 = arith.addf %18, %20 : vector<16x256xf32>
    %cst_17 = arith.constant 0.000000e+00 : f32
    %22 = vector.broadcast %cst_17 : f32 to vector<16x256xf32>
    %23 = arith.maximumf %21, %22 : vector<16x256xf32>
    %24 = arith.truncf %23 : vector<16x256xf32> to vector<16x256xbf16>
    %c0_18 = arith.constant 0 : index
    %c0_19 = arith.constant 0 : index
    %25 = vector.load %arg7[%c0_18, %c0_19] : memref<256x256xbf16, #tpu.memory_space<vmem>>, vector<256x256xbf16>
    %cst_20 = arith.constant dense<0.000000e+00> : vector<16x256xf32>
    %26 = tpu.matmul %24, %25, %cst_20 {dimension_numbers = #tpu.dot_dimension_numbers<[1], [0], [0], [1], [0, 0, 1, 1], [], []>} : vector<16x256xbf16>, vector<256x256xbf16>, vector<16x256xf32> -> vector<16x256xf32>
    %c0_21 = arith.constant 0 : index
    %c0_22 = arith.constant 0 : index
    %27 = vector.load %arg8[%c0_21, %c0_22] : memref<1x256xf32, #tpu.memory_space<vmem>>, vector<1x256xf32>
    %28 = vector.broadcast %27 : vector<1x256xf32> to vector<16x256xf32>
    %29 = arith.addf %26, %28 : vector<16x256xf32>
    %cst_23 = arith.constant 0.000000e+00 : f32
    %30 = vector.broadcast %cst_23 : f32 to vector<16x256xf32>
    %31 = arith.maximumf %29, %30 : vector<16x256xf32>
    %32 = arith.truncf %31 : vector<16x256xf32> to vector<16x256xbf16>
    %c0_24 = arith.constant 0 : index
    %c0_25 = arith.constant 0 : index
    %33 = vector.load %arg9[%c0_24, %c0_25] : memref<256x128xbf16, #tpu.memory_space<vmem>>, vector<256x128xbf16>
    %cst_26 = arith.constant dense<0.000000e+00> : vector<16x128xf32>
    %34 = tpu.matmul %32, %33, %cst_26 {dimension_numbers = #tpu.dot_dimension_numbers<[1], [0], [0], [1], [0, 0, 1, 1], [], []>} : vector<16x256xbf16>, vector<256x128xbf16>, vector<16x128xf32> -> vector<16x128xf32>
    %c0_27 = arith.constant 0 : index
    %c0_28 = arith.constant 0 : index
    %35 = vector.load %arg10[%c0_27, %c0_28] : memref<1x128xf32, #tpu.memory_space<vmem>>, vector<1x128xf32>
    %36 = vector.broadcast %35 : vector<1x128xf32> to vector<16x128xf32>
    %37 = arith.addf %34, %36 : vector<16x128xf32>
    %cst_29 = arith.constant 0.000000e+00 : f32
    %38 = vector.broadcast %cst_29 : f32 to vector<16x128xf32>
    %39 = arith.maximumf %37, %38 : vector<16x128xf32>
    %40 = arith.truncf %39 : vector<16x128xf32> to vector<16x128xbf16>
    %c0_30 = arith.constant 0 : index
    %c0_31 = arith.constant 0 : index
    %41 = vector.load %arg11[%c0_30, %c0_31] : memref<128x128xbf16, #tpu.memory_space<vmem>>, vector<128x128xbf16>
    %cst_32 = arith.constant dense<0.000000e+00> : vector<16x128xf32>
    %42 = tpu.matmul %40, %41, %cst_32 {dimension_numbers = #tpu.dot_dimension_numbers<[1], [0], [0], [1], [0, 0, 1, 1], [], []>} : vector<16x128xbf16>, vector<128x128xbf16>, vector<16x128xf32> -> vector<16x128xf32>
    %c0_33 = arith.constant 0 : index
    %c0_34 = arith.constant 0 : index
    %43 = vector.load %arg12[%c0_33, %c0_34] : memref<1x128xf32, #tpu.memory_space<vmem>>, vector<1x128xf32>
    %44 = vector.broadcast %43 : vector<1x128xf32> to vector<16x128xf32>
    %45 = arith.addf %42, %44 : vector<16x128xf32>
    %46 = arith.truncf %45 : vector<16x128xf32> to vector<16x128xbf16>
    %c0_35 = arith.constant 0 : index
    %c0_36 = arith.constant 0 : index
    %47 = vector.load %arg13[%c0_35, %c0_36] : memref<16x128xbf16, #tpu.memory_space<vmem>>, vector<16x128xbf16>
    tpu.vector_store %arg13[%c0_35, %c0_36], %46 {strides = array<i32>} : memref<16x128xbf16, #tpu.memory_space<vmem>>, vector<16x128xbf16>,
    return
  }
}

</mosaic_0001>

<bundles_post_ra>
// kernel: tpu_custom_call.1
= control target key start
LH: loop header
LB: loop body
LE: loop exit
PB: predicated region body
PF: predicated region fallthrough
CT: control target
= control target key end

     0   :  { %18 = vsyncpa [#allocation3], 0  ;;  %s5855_s0 = inlined_call_operand.hbm [shape: bf16[16,256], index: 0, kind: input, shape index: {}]   ;;  %s5856_s1 = inlined_call_operand.hbm [shape: bf16[256,1024], index: 1, kind: input, shape index: {}]   ;;  %s5857_s2 = inlined_call_operand.hbm [shape: f32[1,1024], index: 2, kind: input, shape index: {}]   ;;  %s5858_s3 = inlined_call_operand.hbm [shape: bf16[1024,512], index: 3, kind: input, shape index: {}]   ;;  %s5859_s4 = inlined_call_operand.vmem [shape: f32[1,512], index: 4, kind: input, shape index: {}]   ;;  %s5860_s5 = inlined_call_operand.hbm [shape: bf16[512,256], index: 5, kind: input, shape index: {}]   ;;  %s5861_s6 = inlined_call_operand.vmem [shape: f32[1,256], index: 6, kind: input, shape index: {}]   ;;  %s5862_s7 = inlined_call_operand.hbm [shape: bf16[256,256], index: 7, kind: input, shape index: {}]   ;;  %s5863_s8 = inlined_call_operand.vmem [shape: f32[1,256], index: 8, kind: input, shape index: {}]   ;;  %s5864_s9 = inlined_call_operand.hbm [shape: bf16[256,128], index: 9, kind: input, shape index: {}]   ;;  %s5865_s10 = inlined_call_operand.vmem [shape: f32[1,128], index: 10, kind: input, shape index: {}]   ;;  %s5866_s11 = inlined_call_operand.hbm [shape: bf16[128,128], index: 11, kind: input, shape index: {}]   ;;  %s5867_s12 = inlined_call_operand.vmem [shape: f32[1,128], index: 12, kind: input, shape index: {}]   ;;  %s5868_s13 = inlined_call_operand.hbm [shape: bf16[16,128], index: 13, kind: output, shape index: {}]  }
   0x1   :  { %19 = vsyncpa [#allocation6], 0 }
   0x2   :  { %20 = vsyncpa [#allocation9], 0 }
   0x3   :  { %21 = vsyncpa [#allocation12], 0 }
   0x4   :  { %22 = vsyncpa [#allocation15], 0 }
   0x5   :  { %23 = vsyncpa [#allocation4], 0  ;;  %s5540_s25 = smov [#allocation5]   ;;  %s5330_s29 = scalar_lea.hbm %s5856_s1, 16384 }
   0x6   :  { %s41_s26 = sshll.u32 %s5540_s25, 4  ;;  %p5331_p0 = scmp.ne.s32.totalorder %s5856_s1, %s5330_s29  ;;  %s42_s26 = int_to_ptr.vmem [resolvable:$true] %s41_s26 }
   0x7   :  { %p5334_p1 = scmp.lt.u32.totalorder %s5330_s29, %s5856_s1 }
   0x9   :  { %p5336_p2 = pnand %p5334_p1, %p5331_p0 }
   0xb   :  { %5339 = shalt.err (!%p5336_p2)
}
   0xc   :  { %s5340_s17 = scalar_lea.vmem %s42_s26, 16384  ;;  %p5345_p4 = scmp.lt.s32.totalorder %s42_s26, %s42_s26 }
   0xd   :  { %p5341_p3 = scmp.ne.s32.totalorder %s42_s26, %s5340_s17  ;;  %p5346_p5 = scmp.lt.s32.totalorder %s5340_s17, %s5340_s17 }
   0xf   :  { %p5347_p6 = por %p5346_p5, %p5345_p4 }
  0x11   :  { %p5348_p7 = pnand %p5347_p6, %p5341_p3 }
  0x13   :  { %5351 = shalt.err (!%p5348_p7)
}
  0x14   :  { %s5541_s18 = smov 512   ;;  %s5542_s19 = smov 32  }
  0x15   :  { %47 = dma.hbm_to_vmem [thread:$0]  %s5856_s1, 16384, %s42_s26, [#allocation6], %s5541_s18, %s5541_s18, %s5542_s19  }
  0x16   :  { %s5543_s22 = smov [#allocation8]   ;;  %s5352_s27 = scalar_lea.hbm %s5858_s3, 32768 }
  0x17   :  { %s63_s23 = sshll.u32 %s5543_s22, 4  ;;  %p5353_p8 = scmp.ne.s32.totalorder %s5858_s3, %s5352_s27  ;;  %s64_s23 = int_to_ptr.vmem [resolvable:$true] %s63_s23 }
  0x18   :  { %p5356_p9 = scmp.lt.u32.totalorder %s5352_s27, %s5858_s3 }
  0x1a   :  { %p5358_p10 = pnand %p5356_p9, %p5353_p8 }
  0x1c   :  { %5361 = shalt.err (!%p5358_p10)
}
  0x1d   :  { %s5362_s15 = scalar_lea.vmem %s64_s23, 32768  ;;  %p5367_p12 = scmp.lt.s32.totalorder %s64_s23, %s64_s23 }
  0x1e   :  { %p5363_p11 = scmp.ne.s32.totalorder %s64_s23, %s5362_s15  ;;  %p5368_p13 = scmp.lt.s32.totalorder %s5362_s15, %s5362_s15 }
  0x20   :  { %p5369_p0 = por %p5368_p13, %p5367_p12 }
  0x22   :  { %p5370_p1 = pnand %p5369_p0, %p5363_p11 }
  0x24   :  { %5373 = shalt.err (!%p5370_p1)
}
  0x25   :  { %s5544_s1 = smov 256   ;;  %s5545_s26 = smov 16  }
  0x26   :  { %69 = dma.hbm_to_vmem [thread:$0]  %s5858_s3, 32768, %s64_s23, [#allocation9], %s5544_s1, %s5544_s1, %s5545_s26  }
  0x27   :  { %s5546_s18 = smov [#allocation11]   ;;  %s5547_s20 = smov [#allocation2]  }
  0x28   :  { %s91_s19 = sshll.u32 %s5546_s18, 4  ;;  %s29_s21 = sshll.u32 %s5547_s20, 4  ;;  %s92_s19 = int_to_ptr.vmem [resolvable:$true] %s91_s19  ;;  %s5653_s21 = int_to_ptr.vmem [resolvable:$true] %s29_s21 }
  0x29   :  { %s5374_s25 = scalar_lea.hbm %s5862_s7, 4096 }
  0x2a   :  { %p5375_p2 = scmp.ne.s32.totalorder %s5862_s7, %s5374_s25  ;;  %p5378_p3 = scmp.lt.u32.totalorder %s5374_s25, %s5862_s7 }
  0x2c   :  { %p5380_p4 = pnand %p5378_p3, %p5375_p2 }
  0x2e   :  { %5383 = shalt.err (!%p5380_p4)
}
  0x2f   :  { %s5384_s3 = scalar_lea.vmem %s92_s19, 4096  ;;  %p5389_p6 = scmp.lt.s32.totalorder %s92_s19, %s92_s19 }
  0x30   :  { %p5385_p5 = scmp.ne.s32.totalorder %s92_s19, %s5384_s3  ;;  %p5390_p7 = scmp.lt.s32.totalorder %s5384_s3, %s5384_s3 }
  0x32   :  { %p5391_p8 = por %p5390_p7, %p5389_p6 }
  0x34   :  { %p5392_p9 = pnand %p5391_p8, %p5385_p5 }
  0x36   :  { %5395 = shalt.err (!%p5392_p9)
}
  0x37   :  { %s5548_s23 = smov 128   ;;  %s5549_s14 = smov 8  }
  0x38   :  { %97 = dma.hbm_to_vmem [thread:$0]  %s5862_s7, 4096, %s92_s19, [#allocation12], %s5548_s23, %s5548_s23, %s5549_s14  }
  0x39   :  { %s5396_s17 = scalar_lea.hbm %s5855_s0, 256 }
  0x3a   :  { %p5397_p10 = scmp.ne.s32.totalorder %s5855_s0, %s5396_s17  ;;  %p5400_p11 = scmp.lt.u32.totalorder %s5396_s17, %s5855_s0 }
  0x3c   :  { %p5402_p12 = pnand %p5400_p11, %p5397_p10 }
  0x3e   :  { %5405 = shalt.err (!%p5402_p12)
}
  0x3f   :  { %s5406_s25 = scalar_lea.vmem %s5653_s21, 256  ;;  %p5411_p0 = scmp.lt.s32.totalorder %s5653_s21, %s5653_s21 }
  0x40   :  { %p5407_p13 = scmp.ne.s32.totalorder %s5653_s21, %s5406_s25  ;;  %p5412_p1 = scmp.lt.s32.totalorder %s5406_s25, %s5406_s25 }
  0x42   :  { %p5413_p2 = por %p5412_p1, %p5411_p0 }
  0x44   :  { %p5414_p3 = pnand %p5413_p2, %p5407_p13 }
  0x46   :  { %5417 = shalt.err (!%p5414_p3)
}
  0x47   :  { %35 = dma.hbm_to_vmem [thread:$0]  %s5855_s0, 256, %s5653_s21, [#allocation3], %s5548_s23, %s5548_s23, %s5549_s14  }
  0x48   :  { %s5550_s27 = smov [#allocation7]   ;;  %s5551_s29 = smov [#allocation10]  }
  0x49   :  { %s54_s28 = sshll.u32 %s5550_s27, 4  ;;  %s77_s30 = sshll.u32 %s5551_s29, 4  ;;  %s55_s28 = int_to_ptr.vmem [resolvable:$true] %s54_s28  ;;  %s5690_s30 = int_to_ptr.vmem [resolvable:$true] %s77_s30 }
  0x4a   :  { %s5418_s1 = scalar_lea.hbm %s5857_s2, 128 }
  0x4b   :  { %p5419_p4 = scmp.ne.s32.totalorder %s5857_s2, %s5418_s1  ;;  %p5422_p5 = scmp.lt.u32.totalorder %s5418_s1, %s5857_s2 }
  0x4d   :  { %p5424_p6 = pnand %p5422_p5, %p5419_p4 }
  0x4f   :  { %5427 = shalt.err (!%p5424_p6)
}
  0x50   :  { %s5428_s0 = scalar_lea.vmem %s55_s28, 128  ;;  %p5433_p8 = scmp.lt.s32.totalorder %s55_s28, %s55_s28 }
  0x51   :  { %p5429_p7 = scmp.ne.s32.totalorder %s55_s28, %s5428_s0  ;;  %p5434_p9 = scmp.lt.s32.totalorder %s5428_s0, %s5428_s0 }
  0x53   :  { %p5435_p10 = por %p5434_p9, %p5433_p8 }
  0x55   :  { %p5436_p11 = pnand %p5435_p10, %p5429_p7 }
  0x57   :  { %5439 = shalt.err (!%p5436_p11)
}
  0x58   :  { %57 = dma.hbm_to_vmem [thread:$0]  %s5857_s2, 128, %s55_s28, [#allocation6]  }
  0x59   :  { %s5440_s25 = scalar_lea.hbm %s5860_s5, 8192 }
  0x5a   :  { %p5441_p12 = scmp.ne.s32.totalorder %s5860_s5, %s5440_s25  ;;  %p5444_p13 = scmp.lt.u32.totalorder %s5440_s25, %s5860_s5 }
  0x5c   :  { %p5446_p0 = pnand %p5444_p13, %p5441_p12 }
  0x5e   :  { %5449 = shalt.err (!%p5446_p0)
}
  0x5f   :  { %s5450_s3 = scalar_lea.vmem %s5690_s30, 8192  ;;  %p5455_p2 = scmp.lt.s32.totalorder %s5690_s30, %s5690_s30 }
  0x60   :  { %p5451_p1 = scmp.ne.s32.totalorder %s5690_s30, %s5450_s3  ;;  %p5456_p3 = scmp.lt.s32.totalorder %s5450_s3, %s5450_s3 }
  0x62   :  { %p5457_p4 = por %p5456_p3, %p5455_p2 }
  0x64   :  { %p5458_p5 = pnand %p5457_p4, %p5451_p1 }
  0x66   :  { %5461 = shalt.err (!%p5458_p5)
}
  0x67   :  { %83 = dma.hbm_to_vmem [thread:$0]  %s5860_s5, 8192, %s5690_s30, [#allocation9], %s5548_s23, %s5548_s23, %s5549_s14  }
  0x68   :  { %s5552_s15 = smov [#allocation13]   ;;  %s5462_s17 = scalar_lea.hbm %s5864_s9, 2048 }
  0x69   :  { %s105_s1 = sshll.u32 %s5552_s15, 4  ;;  %p5463_p6 = scmp.ne.s32.totalorder %s5864_s9, %s5462_s17  ;;  %s106_s1 = int_to_ptr.vmem [resolvable:$true] %s105_s1 }
  0x6a   :  { %p5466_p7 = scmp.lt.u32.totalorder %s5462_s17, %s5864_s9 }
  0x6c   :  { %p5468_p8 = pnand %p5466_p7, %p5463_p6 }
  0x6e   :  { %5471 = shalt.err (!%p5468_p8)
}
  0x6f   :  { %s5472_s22 = scalar_lea.vmem %s106_s1, 2048  ;;  %p5477_p10 = scmp.lt.s32.totalorder %s106_s1, %s106_s1 }
  0x70   :  { %p5473_p9 = scmp.ne.s32.totalorder %s106_s1, %s5472_s22  ;;  %p5478_p11 = scmp.lt.s32.totalorder %s5472_s22, %s5472_s22 }
  0x72   :  { %p5479_p12 = por %p5478_p11, %p5477_p10 }
  0x74   :  { %p5480_p13 = pnand %p5479_p12, %p5473_p9 }
  0x76   :  { %5483 = shalt.err (!%p5480_p13)
}
  0x77   :  { %s5553_s5 = smov 64   ;;  %s5554_s23 = smov 4  }
  0x78   :  { %111 = dma.hbm_to_vmem [thread:$0]  %s5864_s9, 2048, %s106_s1, [#allocation12], %s5553_s5, %s5553_s5, %s5554_s23  }
  0x79   :  { %s5555_s24 = smov [#allocation14]   ;;  %s5484_s27 = scalar_lea.hbm %s5866_s11, 1024 }
  0x7a   :  { %s119_s25 = sshll.u32 %s5555_s24, 4  ;;  %p5485_p0 = scmp.ne.s32.totalorder %s5866_s11, %s5484_s27  ;;  %s120_s25 = int_to_ptr.vmem [resolvable:$true] %s119_s25 }
  0x7b   :  { %p5488_p1 = scmp.lt.u32.totalorder %s5484_s27, %s5866_s11 }
  0x7d   :  { %p5490_p2 = pnand %p5488_p1, %p5485_p0 }
  0x7f   :  { %5493 = shalt.err (!%p5490_p2)
}
  0x80   :  { %s5494_s15 = scalar_lea.vmem %s120_s25, 1024  ;;  %p5499_p4 = scmp.lt.s32.totalorder %s120_s25, %s120_s25 }
  0x81   :  { %p5495_p3 = scmp.ne.s32.totalorder %s120_s25, %s5494_s15  ;;  %p5500_p5 = scmp.lt.s32.totalorder %s5494_s15, %s5494_s15 }
  0x83   :  { %p5501_p6 = por %p5500_p5, %p5499_p4 }
  0x85   :  { %p5502_p7 = pnand %p5501_p6, %p5495_p3 }
  0x87   :  { %5505 = shalt.err (!%p5502_p7)
}
  0x88   :  { %125 = dma.hbm_to_vmem [thread:$0]  %s5866_s11, 1024, %s120_s25, [#allocation15], %s5553_s5, %s5553_s5, %s5554_s23  }
  0x89   :  { %5528 = dma.done.wait [#allocation3], 256  }
  0x8a   :  { %5529 = vsyncadd [#allocation3], 4294967040 }
  0x8b   :  { %5530 = dma.done.wait [#allocation6], 16512  }
  0x8c   :  { %5531 = vsyncadd [#allocation6], 4294950784 }
  0x8d   :  { %5532 = dma.done.wait [#allocation9], 40960  }
  0x8e   :  { %5533 = vsyncadd [#allocation9], 4294926336 }
  0x8f   :  { %5534 = dma.done.wait [#allocation12], 6144  }
  0x90   :  { %5535 = vsyncadd [#allocation12], 4294961152 }
  0x91   :  { %5536 = dma.done.wait [#allocation15], 1024  }
  0x92   :  { %5537 = vsyncadd [#allocation15], 4294966272  ;;  %v155_v0 = vld [vmem:[#allocation5] sm:$0xff]  ;;  %v156_v17 = vld [vmem:[#allocation5 + $0x8] sm:$0xff]  ;;  %vm5557_vm0 = vmmov 0   ;;  %s5558_s20 = smov [#allocation16]  }
  0x93   :  { %v159_v1 = vld [vmem:[#allocation5 + $0x20] sm:$0xff]  ;;  %v160_v18 = vld [vmem:[#allocation5 + $0x28] sm:$0xff]  ;;  %v5754_v22 = vld [vmem:[#allocation2 + $0x4] ss:$8 sps:$4 sm:$0xff]  }
  0x94   :  { %v163_v2 = vld [vmem:[#allocation5 + $0x40] sm:$0xff]  ;;  %v4151_v3 = vcombine.high %v155_v0, %v159_v1  ;;  %v4150_v4 = vcombine.low %v155_v0, %v159_v1  ;;  %v4153_v20 = vcombine.high %v156_v17, %v160_v18  ;;  %v4152_v21 = vcombine.low %v156_v17, %v160_v18  ;;  %v164_v23 = vld [vmem:[#allocation5 + $0x48] sm:$0xff]  ;;  %1007 = vmatprep.mubr.bf16.mxu0 %v5754_v22 }
  0x95   :  { %v167_v5 = vld [vmem:[#allocation5 + $0x60] sm:$0xff]  ;;  %v168_v25 = vld [vmem:[#allocation5 + $0x68] sm:$0xff]  ;;  %1050 = vmatprep.mubr.bf16.mxu1 %v5754_v22 }
  0x96   :  { %v4159_v6 = vcombine.high %v163_v2, %v167_v5  ;;  %v171_v7 = vld [vmem:[#allocation5 + $0x80] sm:$0xff]  ;;  %975 = vmatprep.subr.bf16.mxu0 %v4151_v3  ;;  %v4158_v9 = vcombine.low %v163_v2, %v167_v5  ;;  %v172_v26 = vld [vmem:[#allocation5 + $0x88] sm:$0xff]  ;;  %1018 = vmatprep.subr.bf16.mxu1 %v4153_v20  ;;  %v4161_v30 = vcombine.high %v164_v23, %v168_v25 }
  0x97   :  { %v175_v8 = vld [vmem:[#allocation5 + $0xa0] sm:$0xff]  ;;  %976 = vmatpush1.bf16.msra.mxu0 %v4150_v4  ;;  %v176_v27 = vld [vmem:[#allocation5 + $0xa8] sm:$0xff]  ;;  %1019 = vmatpush1.bf16.msra.mxu1 %v4152_v21  ;;  %v4160_v31 = vcombine.low %v164_v23, %v168_v25 }
  0x98   :  { %977 = vmatprep.subr.bf16.mxu0 %v4159_v6  ;;  %v4167_v10 = vcombine.high %v171_v7, %v175_v8  ;;  %v179_v11 = vld [vmem:[#allocation5 + $0xc0] sm:$0xff]  ;;  %v4166_v13 = vcombine.low %v171_v7, %v175_v8  ;;  %1020 = vmatprep.subr.bf16.mxu1 %v4161_v30  ;;  %v4169_v33 = vcombine.high %v172_v26, %v176_v27  ;;  %v180_v35 = vld [vmem:[#allocation5 + $0xc8] sm:$0xff] }
  0x99   :  { %v183_v12 = vld [vmem:[#allocation5 + $0xe0] sm:$0xff]  ;;  %v184_v36 = vld [vmem:[#allocation5 + $0xe8] sm:$0xff]  ;;  %v4168_v39 = vcombine.low %v172_v26, %v176_v27 }
  0x9a   :  { %v4175_v14 = vcombine.high %v179_v11, %v183_v12  ;;  %v187_v15 = vld [vmem:[#allocation5 + $0x100] sm:$0xff]  ;;  %v4174_v19 = vcombine.low %v179_v11, %v183_v12  ;;  %v4177_v41 = vcombine.high %v180_v35, %v184_v36  ;;  %v188_v43 = vld [vmem:[#allocation5 + $0x108] sm:$0xff]  ;;  %v4176_v47 = vcombine.low %v180_v35, %v184_v36 }
  0x9b   :  { %978 = vmatpush1.bf16.msra.mxu0 %v4158_v9  ;;  %v191_v16 = vld [vmem:[#allocation5 + $0x120] sm:$0xff]  ;;  %1021 = vmatpush1.bf16.msra.mxu1 %v4160_v31  ;;  %v192_v44 = vld [vmem:[#allocation5 + $0x128] sm:$0xff] }
  0x9c   :  { %979 = vmatprep.subr.bf16.mxu0 %v4167_v10  ;;  %v4183_v24 = vcombine.high %v187_v15, %v191_v16  ;;  %v195_v28 = vld [vmem:[#allocation5 + $0x140] sm:$0xff]  ;;  %v4182_v32 = vcombine.low %v187_v15, %v191_v16  ;;  %1022 = vmatprep.subr.bf16.mxu1 %v4169_v33  ;;  %v4185_v49 = vcombine.high %v188_v43, %v192_v44  ;;  %v196_v51 = vld [vmem:[#allocation5 + $0x148] sm:$0xff] }
  0x9d   :  { %v199_v29 = vld [vmem:[#allocation5 + $0x160] sm:$0xff]  ;;  %v200_v52 = vld [vmem:[#allocation5 + $0x168] sm:$0xff]  ;;  %v4184_v55 = vcombine.low %v188_v43, %v192_v44 }
  0x9e   :  { %v4191_v34 = vcombine.high %v195_v28, %v199_v29  ;;  %v203_v37 = vld [vmem:[#allocation5 + $0x180] sm:$0xff]  ;;  %v4190_v40 = vcombine.low %v195_v28, %v199_v29  ;;  %v4193_v57 = vcombine.high %v196_v51, %v200_v52  ;;  %v204_v59 = vld [vmem:[#allocation5 + $0x188] sm:$0xff]  ;;  %v4192_v63 = vcombine.low %v196_v51, %v200_v52 }
  0x9f   :  { %980 = vmatpush1.bf16.msra.mxu0 %v4166_v13  ;;  %v207_v38 = vld [vmem:[#allocation5 + $0x1a0] sm:$0xff]  ;;  %1023 = vmatpush1.bf16.msra.mxu1 %v4168_v39  ;;  %v208_v60 = vld [vmem:[#allocation5 + $0x1a8] sm:$0xff] }
  0xa0   :  { %981 = vmatprep.subr.bf16.mxu0 %v4175_v14  ;;  %v4199_v42 = vcombine.high %v203_v37, %v207_v38  ;;  %v211_v45 = vld [vmem:[#allocation5 + $0x1c0] sm:$0xff]  ;;  %v4198_v48 = vcombine.low %v203_v37, %v207_v38  ;;  %1024 = vmatprep.subr.bf16.mxu1 %v4177_v41  ;;  %v4201_v1 = vcombine.high %v204_v59, %v208_v60  ;;  %v212_v3 = vld [vmem:[#allocation5 + $0x1c8] sm:$0xff] }
  0xa1   :  { %v215_v46 = vld [vmem:[#allocation5 + $0x1e0] sm:$0xff]  ;;  %v216_v4 = vld [vmem:[#allocation5 + $0x1e8] sm:$0xff]  ;;  %v4200_v7 = vcombine.low %v204_v59, %v208_v60 }
  0xa2   :  { %v4207_v50 = vcombine.high %v211_v45, %v215_v46  ;;  %v219_v53 = vld [vmem:[#allocation5 + $0x200] sm:$0xff]  ;;  %v4206_v56 = vcombine.low %v211_v45, %v215_v46  ;;  %v4209_v9 = vcombine.high %v212_v3, %v216_v4  ;;  %v220_v11 = vld [vmem:[#allocation5 + $0x208] sm:$0xff]  ;;  %v4208_v15 = vcombine.low %v212_v3, %v216_v4 }
  0xa3   :  { %982 = vmatpush1.bf16.msra.mxu0 %v4174_v19  ;;  %v223_v54 = vld [vmem:[#allocation5 + $0x220] sm:$0xff]  ;;  %1025 = vmatpush1.bf16.msra.mxu1 %v4176_v47  ;;  %v224_v12 = vld [vmem:[#allocation5 + $0x228] sm:$0xff] }
  0xa4   :  { %983 = vmatprep.subr.bf16.mxu0 %v4183_v24  ;;  %1026 = vmatprep.subr.bf16.mxu1 %v4185_v49  ;;  %v4215_v58 = vcombine.high %v219_v53, %v223_v54  ;;  %v227_v61 = vld [vmem:[#allocation5 + $0x240] sm:$0xff]  ;;  %v4214_v0 = vcombine.low %v219_v53, %v223_v54  ;;  %v4217_v17 = vcombine.high %v220_v11, %v224_v12  ;;  %v228_v19 = vld [vmem:[#allocation5 + $0x248] sm:$0xff]  ;;  %v157_v54 = vld [vmem:[#allocation5 + $0x10] sm:$0xff] }
  0xa5   :  { %v231_v62 = vld [vmem:[#allocation5 + $0x260] sm:$0xff]  ;;  %v232_v20 = vld [vmem:[#allocation5 + $0x268] sm:$0xff]  ;;  %v4216_v24 = vcombine.low %v220_v11, %v224_v12  ;;  %v158_v12 = vld [vmem:[#allocation5 + $0x18] sm:$0xff] }
  0xa6   :  { %v4223_v2 = vcombine.high %v227_v61, %v231_v62  ;;  %v235_v5 = vld [vmem:[#allocation5 + $0x280] sm:$0xff]  ;;  %v4222_v8 = vcombine.low %v227_v61, %v231_v62  ;;  %v4225_v26 = vcombine.high %v228_v19, %v232_v20  ;;  %v236_v27 = vld [vmem:[#allocation5 + $0x288] sm:$0xff]  ;;  %v165_v62 = vld [vmem:[#allocation5 + $0x50] sm:$0xff] }
  0xa7   :  { %984 = vmatpush1.bf16.msra.mxu0 %v4182_v32  ;;  %1027 = vmatpush1.bf16.msra.mxu1 %v4184_v55  ;;  %v239_v6 = vld [vmem:[#allocation5 + $0x2a0] sm:$0xff]  ;;  %v240_v29 = vld [vmem:[#allocation5 + $0x2a8] sm:$0xff]  ;;  %v4224_v32 = vcombine.low %v228_v19, %v232_v20  ;;  %v161_v55 = vld [vmem:[#allocation5 + $0x30] sm:$0xff] }
  0xa8   :  { %985 = vmatprep.subr.bf16.mxu0 %v4191_v34  ;;  %1028 = vmatprep.subr.bf16.mxu1 %v4193_v57  ;;  %v4231_v10 = vcombine.high %v235_v5, %v239_v6  ;;  %v243_v13 = vld [vmem:[#allocation5 + $0x2c0] sm:$0xff]  ;;  %v4230_v16 = vcombine.low %v235_v5, %v239_v6  ;;  %v4233_v34 = vcombine.high %v236_v27, %v240_v29  ;;  %v244_v35 = vld [vmem:[#allocation5 + $0x2c8] sm:$0xff]  ;;  %v166_v20 = vld [vmem:[#allocation5 + $0x58] sm:$0xff] }
  0xa9   :  { %v247_v14 = vld [vmem:[#allocation5 + $0x2e0] sm:$0xff]  ;;  %v248_v37 = vld [vmem:[#allocation5 + $0x2e8] sm:$0xff]  ;;  %v4155_v61 = vcombine.high %v157_v54, %v161_v55  ;;  %v4154_v4 = vcombine.low %v157_v54, %v161_v55  ;;  %v225_v54 = vld [vmem:[#allocation5 + $0x230] sm:$0xff] }
  0xaa   :  { %v4239_v18 = vcombine.high %v243_v13, %v247_v14  ;;  %v251_v21 = vld [vmem:[#allocation5 + $0x300] sm:$0xff]  ;;  %v4238_v25 = vcombine.low %v243_v13, %v247_v14  ;;  %v252_v43 = vld [vmem:[#allocation5 + $0x308] sm:$0xff]  ;;  %v162_v14 = vld [vmem:[#allocation5 + $0x38] sm:$0xff] }
  0xab   :  { %986 = vmatpush1.bf16.msra.mxu0 %v4190_v40  ;;  %1029 = vmatpush1.bf16.msra.mxu1 %v4192_v63  ;;  %v255_v23 = vld [vmem:[#allocation5 + $0x320] sm:$0xff]  ;;  %v4232_v40 = vcombine.low %v236_v27, %v240_v29  ;;  %v256_v45 = vld [vmem:[#allocation5 + $0x328] sm:$0xff]  ;;  %v169_v63 = vld [vmem:[#allocation5 + $0x70] sm:$0xff]  ;;  %v4157_v19 = vcombine.high %v158_v12, %v162_v14 }
  0xac   :  { %987 = vmatprep.subr.bf16.mxu0 %v4199_v42  ;;  %1030 = vmatprep.subr.bf16.mxu1 %v4201_v1  ;;  %v4247_v28 = vcombine.high %v251_v21, %v255_v23  ;;  %v259_v30 = vld [vmem:[#allocation5 + $0x340] sm:$0xff]  ;;  %v4246_v33 = vcombine.low %v251_v21, %v255_v23  ;;  %v4241_v42 = vcombine.high %v244_v35, %v248_v37  ;;  %v260_v51 = vld [vmem:[#allocation5 + $0x348] sm:$0xff]  ;;  %v170_v23 = vld [vmem:[#allocation5 + $0x78] sm:$0xff] }
  0xad   :  { %v263_v31 = vld [vmem:[#allocation5 + $0x360] sm:$0xff]  ;;  %v264_v53 = vld [vmem:[#allocation5 + $0x368] sm:$0xff]  ;;  %v4163_v6 = vcombine.high %v165_v62, %v169_v63  ;;  %v4162_v11 = vcombine.low %v165_v62, %v169_v63  ;;  %v174_v29 = vld [vmem:[#allocation5 + $0x98] sm:$0xff] }
  0xae   :  { %v4255_v36 = vcombine.high %v259_v30, %v263_v31  ;;  %v267_v38 = vld [vmem:[#allocation5 + $0x380] sm:$0xff]  ;;  %v4254_v41 = vcombine.low %v259_v30, %v263_v31  ;;  %v268_v59 = vld [vmem:[#allocation5 + $0x388] sm:$0xff]  ;;  %v4256_v1 = vcombine.low %v260_v51, %v264_v53  ;;  %v178_v31 = vld [vmem:[#allocation5 + $0xb8] sm:$0xff] }
  0xaf   :  { %988 = vmatpush1.bf16.msra.mxu0 %v4198_v48  ;;  %1031 = vmatpush1.bf16.msra.mxu1 %v4200_v7  ;;  %v271_v39 = vld [vmem:[#allocation5 + $0x3a0] sm:$0xff]  ;;  %v4240_v48 = vcombine.low %v244_v35, %v248_v37  ;;  %v272_v60 = vld [vmem:[#allocation5 + $0x3a8] sm:$0xff]  ;;  %v173_v7 = vld [vmem:[#allocation5 + $0x90] sm:$0xff] }
  0xb0   :  { %989 = vmatprep.subr.bf16.mxu0 %v4207_v50  ;;  %1032 = vmatprep.subr.bf16.mxu1 %v4209_v9  ;;  %v4263_v44 = vcombine.high %v267_v38, %v271_v39  ;;  %v275_v46 = vld [vmem:[#allocation5 + $0x3c0] sm:$0xff]  ;;  %v4262_v49 = vcombine.low %v267_v38, %v271_v39  ;;  %v4249_v50 = vcombine.high %v252_v43, %v256_v45  ;;  %v276_v3 = vld [vmem:[#allocation5 + $0x3c8] sm:$0xff]  ;;  %v209_v37 = vld [vmem:[#allocation5 + $0x1b0] sm:$0xff] }
  0xb1   :  { %v279_v47 = vld [vmem:[#allocation5 + $0x3e0] sm:$0xff]  ;;  %v280_v5 = vld [vmem:[#allocation5 + $0x3e8] sm:$0xff]  ;;  %v4264_v9 = vcombine.low %v268_v59, %v272_v60  ;;  %v4173_v38 = vcombine.high %v174_v29, %v178_v31  ;;  %v233_v62 = vld [vmem:[#allocation5 + $0x270] sm:$0xff] }
  0xb2   :  { %v4271_v52 = vcombine.high %v275_v46, %v279_v47  ;;  %v4270_v57 = vcombine.low %v275_v46, %v279_v47  ;;  %v213_v46 = vld [vmem:[#allocation5 + $0x1d0] sm:$0xff] }
  0xb3   :  { %990 = vmatpush1.bf16.msra.mxu0 %v4206_v56  ;;  %1033 = vmatpush1.bf16.msra.mxu1 %v4208_v15  ;;  %v4248_v56 = vcombine.low %v252_v43, %v256_v45  ;;  %v181_v15 = vld [vmem:[#allocation5 + $0xd0] sm:$0xff]  ;;  %v190_v43 = vld [vmem:[#allocation5 + $0x118] sm:$0xff] }
  0xb4   :  { %991 = vmatprep.subr.bf16.mxu0 %v4215_v58  ;;  %1034 = vmatprep.subr.bf16.mxu1 %v4217_v17  ;;  %v4257_v58 = vcombine.high %v260_v51, %v264_v53  ;;  %v4272_v17 = vcombine.low %v276_v3, %v280_v5  ;;  %v217_v47 = vld [vmem:[#allocation5 + $0x1f0] sm:$0xff]  ;;  %v202_v51 = vld [vmem:[#allocation5 + $0x178] sm:$0xff] }
  0xb5   :  { %v221_v53 = vld [vmem:[#allocation5 + $0x210] sm:$0xff] }
  0xb7   :  { %992 = vmatpush1.bf16.msra.mxu0 %v4214_v0  ;;  %1035 = vmatpush1.bf16.msra.mxu1 %v4216_v24  ;;  %v5758_v0 = vld [vmem:[#allocation2] ss:$8 sps:$4 sm:$0xff]  }
  0xb8   :  { %993 = vmatprep.subr.bf16.mxu0 %v4223_v2  ;;  %1036 = vmatprep.subr.bf16.mxu1 %v4225_v26  ;;  %v4265_v2 = vcombine.high %v268_v59, %v272_v60  ;;  %v189_v24 = vld [vmem:[#allocation5 + $0x110] sm:$0xff]  ;;  %v4156_v26 = vcombine.low %v158_v12, %v162_v14  ;;  %v210_v59 = vld [vmem:[#allocation5 + $0x1b8] sm:$0xff]  ;;  %v4210_v60 = vcombine.low %v213_v46, %v217_v47 }
  0xb9   :  { %v226_v12 = vld [vmem:[#allocation5 + $0x238] sm:$0xff]  ;;  %v245_v14 = vld [vmem:[#allocation5 + $0x2d0] sm:$0xff] }
  0xbb   :  { %994 = vmatpush1.bf16.msra.mxu0 %v4222_v8  ;;  %1037 = vmatpush1.bf16.msra.mxu1 %v4224_v32  ;;  %v177_v8 = vld [vmem:[#allocation5 + $0xb0] sm:$0xff] }
  0xbc   :  { %995 = vmatprep.subr.bf16.mxu0 %v4231_v10  ;;  %1038 = vmatprep.subr.bf16.mxu1 %v4233_v34  ;;  %v4273_v10 = vcombine.high %v276_v3, %v280_v5  ;;  %v4171_v13 = vcombine.high %v173_v7, %v177_v8  ;;  %v197_v32 = vld [vmem:[#allocation5 + $0x150] sm:$0xff]  ;;  %v4164_v34 = vcombine.low %v166_v20, %v170_v23  ;;  %v214_v3 = vld [vmem:[#allocation5 + $0x1d8] sm:$0xff] }
  0xbd   :  { %v4218_v5 = vcombine.low %v221_v53, %v225_v54 }
  0xbf   :  { %996 = vmatpush1.bf16.msra.mxu0 %v4230_v16  ;;  %1039 = vmatpush1.bf16.msra.mxu1 %v4232_v40  ;;  %v185_v16 = vld [vmem:[#allocation5 + $0xf0] sm:$0xff]  ;;  %v182_v40 = vld [vmem:[#allocation5 + $0xd8] sm:$0xff] }
  0xc0   :  { %997 = vmatprep.subr.bf16.mxu0 %v4239_v18  ;;  %1040 = vmatprep.subr.bf16.mxu1 %v4241_v42  ;;  %v4170_v18 = vcombine.low %v173_v7, %v177_v8  ;;  %v4179_v21 = vcombine.high %v181_v15, %v185_v16  ;;  %v4178_v27 = vcombine.low %v181_v15, %v185_v16  ;;  %v241_v7 = vld [vmem:[#allocation5 + $0x2b0] sm:$0xff] }
  0xc1   :  { %v4172_v42 = vcombine.low %v174_v29, %v178_v31  ;;  %v249_v15 = vld [vmem:[#allocation5 + $0x2f0] sm:$0xff]  ;;  %v242_v29 = vld [vmem:[#allocation5 + $0x2b8] sm:$0xff] }
  0xc2   :  { %v261_v31 = vld [vmem:[#allocation5 + $0x350] sm:$0xff] }
  0xc3   :  { %998 = vmatpush1.bf16.msra.mxu0 %v4238_v25  ;;  %1041 = vmatpush1.bf16.msra.mxu1 %v4240_v48  ;;  %v193_v25 = vld [vmem:[#allocation5 + $0x130] sm:$0xff] }
  0xc4   :  { %999 = vmatprep.subr.bf16.mxu0 %v4247_v28  ;;  %1042 = vmatprep.subr.bf16.mxu1 %v4249_v50  ;;  %v4165_v28 = vcombine.high %v166_v20, %v170_v23  ;;  %v4187_v30 = vcombine.high %v189_v24, %v193_v25  ;;  %v4186_v35 = vcombine.low %v189_v24, %v193_v25  ;;  %v198_v50 = vld [vmem:[#allocation5 + $0x158] sm:$0xff]  ;;  %v253_v23 = vld [vmem:[#allocation5 + $0x310] sm:$0xff] }
  0xc5   :  { %v4197_v63 = vcombine.high %v198_v50, %v202_v51  ;;  %v234_v20 = vld [vmem:[#allocation5 + $0x278] sm:$0xff]  ;;  %v257_v24 = vld [vmem:[#allocation5 + $0x330] sm:$0xff] }
  0xc7   :  { %1000 = vmatpush1.bf16.msra.mxu0 %v4246_v33  ;;  %1043 = vmatpush1.bf16.msra.mxu1 %v4248_v56  ;;  %v201_v33 = vld [vmem:[#allocation5 + $0x170] sm:$0xff]  ;;  %v4211_v56 = vcombine.high %v213_v46, %v217_v47 }
  0xc8   :  { %1001 = vmatprep.subr.bf16.mxu0 %v4255_v36  ;;  %1044 = vmatprep.subr.bf16.mxu1 %v4257_v58  ;;  %v205_v36 = vld [vmem:[#allocation5 + $0x190] sm:$0xff]  ;;  %v4195_v39 = vcombine.high %v197_v32, %v201_v33  ;;  %v4194_v45 = vcombine.low %v197_v32, %v201_v33  ;;  %v206_v58 = vld [vmem:[#allocation5 + $0x198] sm:$0xff] }
  0xc9   :  { %v4203_v48 = vcombine.high %v205_v36, %v209_v37  ;;  %v4205_v8 = vcombine.high %v206_v58, %v210_v59  ;;  %v265_v32 = vld [vmem:[#allocation5 + $0x370] sm:$0xff] }
  0xca   :  { %v4258_v46 = vcombine.low %v261_v31, %v265_v32  ;;  %v277_v47 = vld [vmem:[#allocation5 + $0x3d0] sm:$0xff] }
  0xcb   :  { %1002 = vmatpush1.bf16.msra.mxu0 %v4254_v41  ;;  %1045 = vmatpush1.bf16.msra.mxu1 %v4256_v1  ;;  %v186_v41 = vld [vmem:[#allocation5 + $0xf8] sm:$0xff]  ;;  %v4219_v1 = vcombine.high %v221_v53, %v225_v54 }
  0xcc   :  { %1003 = vmatprep.subr.bf16.mxu0 %v4263_v44  ;;  %1046 = vmatprep.subr.bf16.mxu1 %v4265_v2  ;;  %v194_v44 = vld [vmem:[#allocation5 + $0x138] sm:$0xff]  ;;  %v4196_v2 = vcombine.low %v198_v50, %v202_v51 }
  0xcd   :  { %v4189_v55 = vcombine.high %v190_v43, %v194_v44  ;;  %v262_v51 = vld [vmem:[#allocation5 + $0x358] sm:$0xff] }
  0xcf   :  { %1004 = vmatpush1.bf16.msra.mxu0 %v4262_v49  ;;  %1047 = vmatpush1.bf16.msra.mxu1 %v4264_v9  ;;  %v4180_v49 = vcombine.low %v182_v40, %v186_v41 }
  0xd0   :  { %1005 = vmatprep.subr.bf16.mxu0 %v4271_v52  ;;  %1048 = vmatprep.subr.bf16.mxu1 %v4273_v10  ;;  %v4202_v52 = vcombine.low %v205_v36, %v209_v37  ;;  %v4204_v10 = vcombine.low %v206_v58, %v210_v59  ;;  %v246_v36 = vld [vmem:[#allocation5 + $0x2d8] sm:$0xff] }
  0xd1   :  { %v250_v37 = vld [vmem:[#allocation5 + $0x2f8] sm:$0xff] }
  0xd2   :  { %v4244_v50 = vcombine.low %v246_v36, %v250_v37  ;;  %v274_v58 = vld [vmem:[#allocation5 + $0x3b8] sm:$0xff] }
  0xd3   :  { %1006 = vmatpush1.bf16.msra.mxu0 %v4270_v57  ;;  %1049 = vmatpush1.bf16.msra.mxu1 %v4272_v17  ;;  %v4188_v57 = vcombine.low %v190_v43, %v194_v44  ;;  %v254_v44 = vld [vmem:[#allocation5 + $0x318] sm:$0xff] }
  0xd4   :  { %1061 = vmatprep.subr.bf16.mxu0 %v4155_v61  ;;  %1104 = vmatprep.subr.bf16.mxu1 %v4157_v19  ;;  %v229_v61 = vld [vmem:[#allocation5 + $0x250] sm:$0xff]  ;;  %v230_v19 = vld [vmem:[#allocation5 + $0x258] sm:$0xff] }
  0xd5   :  { %v4227_v9 = vcombine.high %v229_v61, %v233_v62  ;;  %v4229_v33 = vcombine.high %v230_v19, %v234_v20  ;;  %v4780_v59 = vld [vmem:[#allocation8 + $0x4] ss:$16 sps:$4 sm:$0xff]  }
  0xd6   :  { %1008 = vmatmul.mubr.bf16.vlgmr.msra.gmra.mrb[0].mxu0 %v5758_v0  ;;  %1051 = vmatmul.mubr.bf16.vlgmr.msra.gmra.mrb[0].mxu1 %v5758_v0 }
  0xd7   :  { %1062 = vmatpush1.bf16.msra.mxu0 %v4154_v4  ;;  %1093 = vmatprep.mubr.bf16.mxu0 %v5754_v22  ;;  %v218_v4 = vld [vmem:[#allocation5 + $0x1f8] sm:$0xff] }
  0xd8   :  { %1063 = vmatprep.subr.bf16.mxu0 %v4163_v6  ;;  %1105 = vmatpush1.bf16.msra.mxu1 %v4156_v26  ;;  %v237_v6 = vld [vmem:[#allocation5 + $0x290] sm:$0xff]  ;;  %v4213_v16 = vcombine.high %v214_v3, %v218_v4  ;;  %v4243_v26 = vcombine.high %v245_v14, %v249_v15 }
  0xd9   :  { %1136 = vmatprep.mubr.bf16.mxu1 %v5754_v22  ;;  %1106 = vmatprep.subr.bf16.mxu1 %v4165_v28  ;;  %v4181_v22 = vcombine.high %v182_v40, %v186_v41  ;;  %v4235_v17 = vcombine.high %v237_v6, %v241_v7  ;;  %v238_v28 = vld [vmem:[#allocation5 + $0x298] sm:$0xff]  ;;  %v273_v40 = vld [vmem:[#allocation5 + $0x3b0] sm:$0xff] }
  0xda   :  { %v4237_v41 = vcombine.high %v238_v28, %v242_v29  ;;  %v4236_v43 = vcombine.low %v238_v28, %v242_v29  ;;  %v4814_v28 = vld [vmem:[#allocation8 + $0xc0] ss:$16 sps:$4 sm:$0xff]   ;;  %v4805_v29 = vld [vmem:[#allocation8 + $0x88] ss:$16 sps:$4 sm:$0xff]  }
  0xdb   :  { %1064 = vmatpush1.bf16.msra.mxu0 %v4162_v11  ;;  %v222_v11 = vld [vmem:[#allocation5 + $0x218] sm:$0xff] }
  0xdc   :  { %1065 = vmatprep.subr.bf16.mxu0 %v4171_v13  ;;  %1107 = vmatpush1.bf16.msra.mxu1 %v4164_v34  ;;  %v4226_v13 = vcombine.low %v229_v61, %v233_v62  ;;  %v4221_v25 = vcombine.high %v222_v11, %v226_v12  ;;  %v4251_v34 = vcombine.high %v253_v23, %v257_v24  ;;  %v4778_v62 = vld [vmem:[#allocation8] ss:$16 sps:$4 sm:$0xff]  }
  0xdd   :  { %1108 = vmatprep.subr.bf16.mxu1 %v4173_v38  ;;  %v4250_v38 = vcombine.low %v253_v23, %v257_v24  ;;  %v4801_v23 = vld [vmem:[#allocation8 + $0x6c] ss:$16 sps:$4 sm:$0xff]   ;;  %v4808_v24 = vld [vmem:[#allocation8 + $0xa0] ss:$16 sps:$4 sm:$0xff]  }
  0xdf   :  { %1066 = vmatpush1.bf16.msra.mxu0 %v4170_v18  ;;  %v4212_v18 = vcombine.low %v214_v3, %v218_v4  ;;  %v4786_v3 = vld [vmem:[#allocation8 + $0x24] ss:$16 sps:$4 sm:$0xff]  }
  0xe0   :  { %1067 = vmatprep.subr.bf16.mxu0 %v4179_v21  ;;  %1109 = vmatpush1.bf16.msra.mxu1 %v4172_v42  ;;  %v4234_v21 = vcombine.low %v237_v6, %v241_v7  ;;  %v4259_v42 = vcombine.high %v261_v31, %v265_v32  ;;  %v4792_v7 = vld [vmem:[#allocation8 + $0x44] ss:$16 sps:$4 sm:$0xff]   ;;  %v4820_v31 = vld [vmem:[#allocation8 + $0xe0] ss:$16 sps:$4 sm:$0xff]  }
  0xe1   :  { %1110 = vmatprep.subr.bf16.mxu1 %v4181_v22  ;;  %v281_v22 = vld [vmem:[#allocation5 + $0x3f0] sm:$0xff]  ;;  %v4828_v32 = vld [vmem:[#allocation8 + $0x104] ss:$16 sps:$4 sm:$0xff]  }
  0xe3   :  { %1068 = vmatpush1.bf16.msra.mxu0 %v4178_v27  ;;  %v4220_v27 = vcombine.low %v222_v11, %v226_v12  ;;  %v4798_v12 = vld [vmem:[#allocation8 + $0x64] ss:$16 sps:$4 sm:$0xff]  }
  0xe4   :  { %1069 = vmatprep.subr.bf16.mxu0 %v4187_v30  ;;  %1111 = vmatpush1.bf16.msra.mxu1 %v4180_v49  ;;  %v4242_v30 = vcombine.low %v245_v14, %v249_v15  ;;  %v4789_v14 = vld [vmem:[#allocation8 + $0x2c] ss:$16 sps:$4 sm:$0xff]   ;;  %v4796_v15 = vld [vmem:[#allocation8 + $0x60] ss:$16 sps:$4 sm:$0xff]  }
  0xe5   :  { %1112 = vmatprep.subr.bf16.mxu1 %v4189_v55  ;;  %v4275_v55 = vcombine.high %v277_v47, %v281_v22 }
  0xe7   :  { %1070 = vmatpush1.bf16.msra.mxu0 %v4186_v35  ;;  %v4228_v35 = vcombine.low %v230_v19, %v234_v20  ;;  %v4802_v19 = vld [vmem:[#allocation8 + $0x80] ss:$16 sps:$4 sm:$0xff]   ;;  %v4810_v20 = vld [vmem:[#allocation8 + $0xa4] ss:$16 sps:$4 sm:$0xff]  }
  0xe8   :  { %1071 = vmatprep.subr.bf16.mxu0 %v4195_v39  ;;  %1113 = vmatpush1.bf16.msra.mxu1 %v4188_v57  ;;  %v269_v39 = vld [vmem:[#allocation5 + $0x390] sm:$0xff]  ;;  %v270_v57 = vld [vmem:[#allocation5 + $0x398] sm:$0xff] }
  0xe9   :  { %1114 = vmatprep.subr.bf16.mxu1 %v4197_v63  ;;  %v4267_v49 = vcombine.high %v269_v39, %v273_v40  ;;  %v4266_v53 = vcombine.low %v269_v39, %v273_v40  ;;  %v4269_v4 = vcombine.high %v270_v57, %v274_v58  ;;  %v4268_v6 = vcombine.low %v270_v57, %v274_v58  ;;  %v4832_v39 = vld [vmem:[#allocation8 + $0x120] ss:$16 sps:$4 sm:$0xff]   ;;  %v4840_v40 = vld [vmem:[#allocation8 + $0x144] ss:$16 sps:$4 sm:$0xff]   ;;  %v4855_v57 = vld [vmem:[#allocation8 + $0x18c] ss:$16 sps:$4 sm:$0xff]  }
  0xea   :  { %v4862_v58 = vld [vmem:[#allocation8 + $0x1c0] ss:$16 sps:$4 sm:$0xff]  }
  0xeb   :  { %1072 = vmatpush1.bf16.msra.mxu0 %v4194_v45  ;;  %v258_v45 = vld [vmem:[#allocation5 + $0x338] sm:$0xff] }
  0xec   :  { %1073 = vmatprep.subr.bf16.mxu0 %v4203_v48  ;;  %1115 = vmatpush1.bf16.msra.mxu1 %v4196_v2  ;;  %v4245_v48 = vcombine.high %v246_v36, %v250_v37  ;;  %v4253_v54 = vcombine.high %v254_v44, %v258_v45  ;;  %v282_v2 = vld [vmem:[#allocation5 + $0x3f8] sm:$0xff]  ;;  %v4817_v37 = vld [vmem:[#allocation8 + $0xc8] ss:$16 sps:$4 sm:$0xff]  }
  0xed   :  { %1116 = vmatprep.subr.bf16.mxu1 %v4205_v8  ;;  %v4834_v36 = vld [vmem:[#allocation8 + $0x124] ss:$16 sps:$4 sm:$0xff]  }
  0xef   :  { %1074 = vmatpush1.bf16.msra.mxu0 %v4202_v52  ;;  %v266_v52 = vld [vmem:[#allocation5 + $0x378] sm:$0xff] }
  0xf0   :  { %1075 = vmatprep.subr.bf16.mxu0 %v4211_v56  ;;  %1117 = vmatpush1.bf16.msra.mxu1 %v4204_v10  ;;  %v4252_v56 = vcombine.low %v254_v44, %v258_v45  ;;  %v4261_v61 = vcombine.high %v262_v51, %v266_v52  ;;  %v4260_v63 = vcombine.low %v262_v51, %v266_v52  ;;  %v4790_v10 = vld [vmem:[#allocation8 + $0x40] ss:$16 sps:$4 sm:$0xff]   ;;  %v4846_v44 = vld [vmem:[#allocation8 + $0x164] ss:$16 sps:$4 sm:$0xff]   ;;  %v4829_v45 = vld [vmem:[#allocation8 + $0x108] ss:$16 sps:$4 sm:$0xff]  }
  0xf1   :  { %1118 = vmatprep.subr.bf16.mxu1 %v4213_v16  ;;  %v4804_v16 = vld [vmem:[#allocation8 + $0x84] ss:$16 sps:$4 sm:$0xff]   ;;  %v4841_v52 = vld [vmem:[#allocation8 + $0x148] ss:$16 sps:$4 sm:$0xff]  }
  0xf2   :  { %v4858_v51 = vld [vmem:[#allocation8 + $0x1a4] ss:$16 sps:$4 sm:$0xff]  }
  0xf3   :  { %1076 = vmatpush1.bf16.msra.mxu0 %v4210_v60  ;;  %v4274_v60 = vcombine.low %v277_v47, %v281_v22  ;;  %v4844_v47 = vld [vmem:[#allocation8 + $0x160] ss:$16 sps:$4 sm:$0xff]   ;;  %v4852_v22 = vld [vmem:[#allocation8 + $0x184] ss:$16 sps:$4 sm:$0xff]  }
  0xf4   :  { %1077 = vmatprep.subr.bf16.mxu0 %v4219_v1  ;;  %1119 = vmatpush1.bf16.msra.mxu1 %v4212_v18  ;;  %v278_v1 = vld [vmem:[#allocation5 + $0x3d8] sm:$0xff]  ;;  %v4795_v18 = vld [vmem:[#allocation8 + $0x4c] ss:$16 sps:$4 sm:$0xff]  }
  0xf5   :  { %1120 = vmatprep.subr.bf16.mxu1 %v4221_v25  ;;  %v4277_v8 = vcombine.high %v278_v1, %v282_v2  ;;  %v4276_v11 = vcombine.low %v278_v1, %v282_v2  ;;  %v4816_v25 = vld [vmem:[#allocation8 + $0xc4] ss:$16 sps:$4 sm:$0xff]   ;;  %v4859_v1 = vld [vmem:[#allocation8 + $0x1a8] ss:$16 sps:$4 sm:$0xff]   ;;  %v4867_v2 = vld [vmem:[#allocation8 + $0x1cc] ss:$16 sps:$4 sm:$0xff]  }
  0xf7   :  { %1078 = vmatpush1.bf16.msra.mxu0 %v4218_v5  ;;  %v4784_v5 = vld [vmem:[#allocation8 + $0x20] ss:$16 sps:$4 sm:$0xff]  }
  0xf8   :  { %1079 = vmatprep.subr.bf16.mxu0 %v4227_v9  ;;  %1121 = vmatpush1.bf16.msra.mxu1 %v4220_v27  ;;  %v4783_v9 = vld [vmem:[#allocation8 + $0xc] ss:$16 sps:$4 sm:$0xff]  }
  0xf9   :  { %1122 = vmatprep.subr.bf16.mxu1 %v4229_v33  ;;  %v4807_v27 = vld [vmem:[#allocation8 + $0x8c] ss:$16 sps:$4 sm:$0xff]   ;;  %v4811_v33 = vld [vmem:[#allocation8 + $0xa8] ss:$16 sps:$4 sm:$0xff]  }
  0xfb   :  { %1080 = vmatpush1.bf16.msra.mxu0 %v4226_v13  ;;  %v4781_v13 = vld [vmem:[#allocation8 + $0x8] ss:$16 sps:$4 sm:$0xff]  }
  0xfc   :  { %1081 = vmatprep.subr.bf16.mxu0 %v4235_v17  ;;  %1123 = vmatpush1.bf16.msra.mxu1 %v4228_v35  ;;  %v4787_v17 = vld [vmem:[#allocation8 + $0x28] ss:$16 sps:$4 sm:$0xff]   ;;  %v4826_v35 = vld [vmem:[#allocation8 + $0x100] ss:$16 sps:$4 sm:$0xff]  }
  0xfd   :  { %1124 = vmatprep.subr.bf16.mxu1 %v4237_v41  ;;  %v4823_v41 = vld [vmem:[#allocation8 + $0xe8] ss:$16 sps:$4 sm:$0xff]  }
  0xff   :  { %1082 = vmatpush1.bf16.msra.mxu0 %v4234_v21  ;;  %v4793_v21 = vld [vmem:[#allocation8 + $0x48] ss:$16 sps:$4 sm:$0xff]  }
 0x100   :  { %1083 = vmatprep.subr.bf16.mxu0 %v4243_v26  ;;  %1125 = vmatpush1.bf16.msra.mxu1 %v4236_v43  ;;  %v4799_v26 = vld [vmem:[#allocation8 + $0x68] ss:$16 sps:$4 sm:$0xff]   ;;  %v4838_v43 = vld [vmem:[#allocation8 + $0x140] ss:$16 sps:$4 sm:$0xff]  }
 0x101   :  { %1126 = vmatprep.subr.bf16.mxu1 %v4245_v48  ;;  %v4835_v48 = vld [vmem:[#allocation8 + $0x128] ss:$16 sps:$4 sm:$0xff]  }
 0x103   :  { %1084 = vmatpush1.bf16.msra.mxu0 %v4242_v30  ;;  %v4813_v30 = vld [vmem:[#allocation8 + $0xac] ss:$16 sps:$4 sm:$0xff]  }
 0x104   :  { %1085 = vmatprep.subr.bf16.mxu0 %v4251_v34  ;;  %1127 = vmatpush1.bf16.msra.mxu1 %v4244_v50  ;;  %v4819_v34 = vld [vmem:[#allocation8 + $0xcc] ss:$16 sps:$4 sm:$0xff]   ;;  %v4850_v50 = vld [vmem:[#allocation8 + $0x180] ss:$16 sps:$4 sm:$0xff]  }
 0x105   :  { %1128 = vmatprep.subr.bf16.mxu1 %v4253_v54  ;;  %v4856_v54 = vld [vmem:[#allocation8 + $0x1a0] ss:$16 sps:$4 sm:$0xff]  }
 0x107   :  { %1086 = vmatpush1.bf16.msra.mxu0 %v4250_v38  ;;  %v4825_v38 = vld [vmem:[#allocation8 + $0xec] ss:$16 sps:$4 sm:$0xff]  }
 0x108   :  { %1087 = vmatprep.subr.bf16.mxu0 %v4259_v42  ;;  %1129 = vmatpush1.bf16.msra.mxu1 %v4252_v56  ;;  %v4831_v42 = vld [vmem:[#allocation8 + $0x10c] ss:$16 sps:$4 sm:$0xff]   ;;  %v4847_v56 = vld [vmem:[#allocation8 + $0x168] ss:$16 sps:$4 sm:$0xff]  }
 0x109   :  { %1130 = vmatprep.subr.bf16.mxu1 %v4261_v61  ;;  %v4861_v61 = vld [vmem:[#allocation8 + $0x1ac] ss:$16 sps:$4 sm:$0xff]  }
 0x10b   :  { %1088 = vmatpush1.bf16.msra.mxu0 %v4258_v46  ;;  %v4837_v46 = vld [vmem:[#allocation8 + $0x12c] ss:$16 sps:$4 sm:$0xff]  }
 0x10c   :  { %1089 = vmatprep.subr.bf16.mxu0 %v4267_v49  ;;  %1131 = vmatpush1.bf16.msra.mxu1 %v4260_v63  ;;  %v4843_v49 = vld [vmem:[#allocation8 + $0x14c] ss:$16 sps:$4 sm:$0xff]   ;;  %v4876_v63 = vld [vmem:[#allocation8 + $0x204] ss:$16 sps:$4 sm:$0xff]  }
 0x10d   :  { %1132 = vmatprep.subr.bf16.mxu1 %v4269_v4  ;;  %v4873_v4 = vld [vmem:[#allocation8 + $0x1ec] ss:$16 sps:$4 sm:$0xff]  }
 0x10f   :  { %1090 = vmatpush1.bf16.msra.mxu0 %v4266_v53  ;;  %v4849_v53 = vld [vmem:[#allocation8 + $0x16c] ss:$16 sps:$4 sm:$0xff]  }
 0x110   :  { %1091 = vmatprep.subr.bf16.mxu0 %v4275_v55  ;;  %1133 = vmatpush1.bf16.msra.mxu1 %v4268_v6  ;;  %v4864_v55 = vld [vmem:[#allocation8 + $0x1c4] ss:$16 sps:$4 sm:$0xff]   ;;  %v4879_v6 = vld [vmem:[#allocation8 + $0x20c] ss:$16 sps:$4 sm:$0xff]  }
 0x111   :  { %1134 = vmatprep.subr.bf16.mxu1 %v4277_v8 }
 0x113   :  { %1092 = vmatpush1.bf16.msra.mxu0 %v4274_v60  ;;  %v4853_v60 = vld [vmem:[#allocation8 + $0x188] ss:$16 sps:$4 sm:$0xff]  }
 0x114   :  { %2729 = vmatprep.subr.bf16.mxu0 %v4780_v59  ;;  %1135 = vmatpush1.bf16.msra.mxu1 %v4276_v11  ;;  %v4870_v59 = vld [vmem:[#allocation8 + $0x1e4] ss:$16 sps:$4 sm:$0xff]  }
 0x115   :  { %2901 = vmatprep.subr.bf16.mxu1 %v4783_v9 }
 0x116   :  { %1094 = vmatmul.mubr.bf16.vlgmr.msra.gmra.mrb[4].mxu0 %v5758_v0 }
 0x117   :  { %2730 = vmatpush1.bf16.msra.mxu0 %v4778_v62  ;;  %1137 = vmatmul.mubr.bf16.vlgmr.msra.gmra.mrb[4].mxu1 %v5758_v0  ;;  %v4822_v0 = vld [vmem:[#allocation8 + $0xe4] ss:$16 sps:$4 sm:$0xff]   ;;  %v4868_v62 = vld [vmem:[#allocation8 + $0x1e0] ss:$16 sps:$4 sm:$0xff]  }
 0x118   :  { %2731 = vmatprep.subr.bf16.mxu0 %v4786_v3  ;;  %2902 = vmatpush1.bf16.msra.mxu1 %v4781_v13  ;;  %v4865_v3 = vld [vmem:[#allocation8 + $0x1c8] ss:$16 sps:$4 sm:$0xff]  }
 0x119   :  { %2903 = vmatprep.subr.bf16.mxu1 %v4789_v14 }
 0x11b   :  { %2732 = vmatpush1.bf16.msra.mxu0 %v4784_v5  ;;  %v4871_v5 = vld [vmem:[#allocation8 + $0x1e8] ss:$16 sps:$4 sm:$0xff]  }
 0x11c   :  { %2733 = vmatprep.subr.bf16.mxu0 %v4792_v7  ;;  %2904 = vmatpush1.bf16.msra.mxu1 %v4787_v17  ;;  %v285_v7 = vlaneseq }
 0x11d   :  { %2905 = vmatprep.subr.bf16.mxu1 %v4795_v18 }
 0x11e   :  { %v5766_v8 = vshrl.u32 %v285_v7, 7  ;;  %v4913_v7 = vld [vmem:[#allocation8 + $0x2c8] ss:$16 sps:$4 sm:$0xff]  }
 0x11f   :  { %2734 = vmatpush1.bf16.msra.mxu0 %v4790_v10  ;;  %v5771_v10 = vld [vmem:[#allocation7] sm:$0xff] }
 0x120   :  { %2735 = vmatprep.subr.bf16.mxu0 %v4798_v12  ;;  %2906 = vmatpush1.bf16.msra.mxu1 %v4793_v21  ;;  %v5769_v9 = vsub.s32 0, %v5766_v8  ;;  %v5774_v11 = vsub.s32 1, %v5766_v8 }
 0x121   :  { %2907 = vmatprep.subr.bf16.mxu1 %v4801_v23  ;;  %v295_v23 = vsub.s32 2, %v5766_v8 }
 0x122   :  { %v288_v12 = vrot.slane %v5771_v10, %v5769_v9  ;;  %v292_v13 = vrot.slane %v5771_v10, %v5774_v11 }
 0x123   :  { %2736 = vmatpush1.bf16.msra.mxu0 %v4796_v15 }
 0x124   :  { %2737 = vmatprep.subr.bf16.mxu0 %v4804_v16  ;;  %2908 = vmatpush1.bf16.msra.mxu1 %v4799_v26  ;;  %v299_v26 = vsub.s32 3, %v5766_v8 }
 0x125   :  { %2909 = vmatprep.subr.bf16.mxu1 %v4807_v27 }
 0x127   :  { %2738 = vmatpush1.bf16.msra.mxu0 %v4802_v19 }
 0x128   :  { %2739 = vmatprep.subr.bf16.mxu0 %v4810_v20  ;;  %2910 = vmatpush1.bf16.msra.mxu1 %v4805_v29 }
 0x129   :  { %2911 = vmatprep.subr.bf16.mxu1 %v4813_v30  ;;  %v4874_v30 = vld [vmem:[#allocation8 + $0x200] ss:$16 sps:$4 sm:$0xff]  }
 0x12b   :  { %2740 = vmatpush1.bf16.msra.mxu0 %v4808_v24 }
 0x12c   :  { %2741 = vmatprep.subr.bf16.mxu0 %v4816_v25  ;;  %2912 = vmatpush1.bf16.msra.mxu1 %v4811_v33  ;;  %v4882_v33 = vld [vmem:[#allocation8 + $0x224] ss:$16 sps:$4 sm:$0xff]  }
 0x12d   :  { %2913 = vmatprep.subr.bf16.mxu1 %v4819_v34  ;;  %v4885_v34 = vld [vmem:[#allocation8 + $0x22c] ss:$16 sps:$4 sm:$0xff]  }
 0x12f   :  { %2742 = vmatpush1.bf16.msra.mxu0 %v4814_v28 }
 0x130   :  { %2743 = vmatprep.subr.bf16.mxu0 %v4822_v0  ;;  %2914 = vmatpush1.bf16.msra.mxu1 %v4817_v37  ;;  %v4880_v37 = vld [vmem:[#allocation8 + $0x220] ss:$16 sps:$4 sm:$0xff]  }
 0x131   :  { %2915 = vmatprep.subr.bf16.mxu1 %v4825_v38  ;;  %v4883_v38 = vld [vmem:[#allocation8 + $0x228] ss:$16 sps:$4 sm:$0xff]  }
 0x133   :  { %2744 = vmatpush1.bf16.msra.mxu0 %v4820_v31  ;;  %v4877_v31 = vld [vmem:[#allocation8 + $0x208] ss:$16 sps:$4 sm:$0xff]  }
 0x134   :  { %2745 = vmatprep.subr.bf16.mxu0 %v4828_v32  ;;  %2916 = vmatpush1.bf16.msra.mxu1 %v4823_v41  ;;  %v296_v32 = vrot.slane %v5771_v10, %v295_v23  ;;  %v4888_v41 = vld [vmem:[#allocation8 + $0x244] ss:$16 sps:$4 sm:$0xff]  }
 0x135   :  { %2917 = vmatprep.subr.bf16.mxu1 %v4831_v42  ;;  %v4891_v42 = vld [vmem:[#allocation8 + $0x24c] ss:$16 sps:$4 sm:$0xff]  }
 0x137   :  { %2746 = vmatpush1.bf16.msra.mxu0 %v4826_v35  ;;  %v300_v35 = vrot.slane %v5771_v10, %v299_v26 }
 0x138   :  { %2747 = vmatprep.subr.bf16.mxu0 %v4834_v36  ;;  %2918 = vmatpush1.bf16.msra.mxu1 %v4829_v45 }
 0x139   :  { %2919 = vmatprep.subr.bf16.mxu1 %v4837_v46 }
 0x13b   :  { %2748 = vmatpush1.bf16.msra.mxu0 %v4832_v39 }
 0x13c   :  { %2749 = vmatprep.subr.bf16.mxu0 %v4840_v40  ;;  %2920 = vmatpush1.bf16.msra.mxu1 %v4835_v48 }
 0x13d   :  { %2921 = vmatprep.subr.bf16.mxu1 %v4843_v49  ;;  %v4886_v49 = vld [vmem:[#allocation8 + $0x240] ss:$16 sps:$4 sm:$0xff]  }
 0x13f   :  { %2750 = vmatpush1.bf16.msra.mxu0 %v4838_v43 }
 0x140   :  { %2751 = vmatprep.subr.bf16.mxu0 %v4846_v44  ;;  %2922 = vmatpush1.bf16.msra.mxu1 %v4841_v52  ;;  %v4894_v52 = vld [vmem:[#allocation8 + $0x264] ss:$16 sps:$4 sm:$0xff]  }
 0x141   :  { %2923 = vmatprep.subr.bf16.mxu1 %v4849_v53  ;;  %v4897_v53 = vld [vmem:[#allocation8 + $0x26c] ss:$16 sps:$4 sm:$0xff]  }
 0x143   :  { %2752 = vmatpush1.bf16.msra.mxu0 %v4844_v47 }
 0x144   :  { %2753 = vmatprep.subr.bf16.mxu0 %v4852_v22  ;;  %2924 = vmatpush1.bf16.msra.mxu1 %v4847_v56 }
 0x145   :  { %2925 = vmatprep.subr.bf16.mxu1 %v4855_v57  ;;  %v4892_v57 = vld [vmem:[#allocation8 + $0x260] ss:$16 sps:$4 sm:$0xff]  }
 0x147   :  { %2754 = vmatpush1.bf16.msra.mxu0 %v4850_v50  ;;  %v4889_v50 = vld [vmem:[#allocation8 + $0x248] ss:$16 sps:$4 sm:$0xff]  }
 0x148   :  { %2755 = vmatprep.subr.bf16.mxu0 %v4858_v51  ;;  %2926 = vmatpush1.bf16.msra.mxu1 %v4853_v60  ;;  %v4903_v60 = vld [vmem:[#allocation8 + $0x28c] ss:$16 sps:$4 sm:$0xff]  }
 0x149   :  { %2927 = vmatprep.subr.bf16.mxu1 %v4861_v61  ;;  %v4898_v61 = vld [vmem:[#allocation8 + $0x280] ss:$16 sps:$4 sm:$0xff]  }
 0x14b   :  { %2756 = vmatpush1.bf16.msra.mxu0 %v4856_v54 }
 0x14c   :  { %2757 = vmatprep.subr.bf16.mxu0 %v4864_v55  ;;  %2928 = vmatpush1.bf16.msra.mxu1 %v4859_v1  ;;  %v4909_v1 = vld [vmem:[#allocation8 + $0x2ac] ss:$16 sps:$4 sm:$0xff]  }
 0x14d   :  { %2929 = vmatprep.subr.bf16.mxu1 %v4867_v2  ;;  %v4904_v2 = vld [vmem:[#allocation8 + $0x2a0] ss:$16 sps:$4 sm:$0xff]  }
 0x14f   :  { %2758 = vmatpush1.bf16.msra.mxu0 %v4862_v58  ;;  %v4895_v58 = vld [vmem:[#allocation8 + $0x268] ss:$16 sps:$4 sm:$0xff]  }
 0x150   :  { %2759 = vmatprep.subr.bf16.mxu0 %v4870_v59  ;;  %2930 = vmatpush1.bf16.msra.mxu1 %v4865_v3  ;;  %v4900_v59 = vld [vmem:[#allocation8 + $0x284] ss:$16 sps:$4 sm:$0xff]   ;;  %v4907_v3 = vld [vmem:[#allocation8 + $0x2a8] ss:$16 sps:$4 sm:$0xff]  }
 0x151   :  { %2931 = vmatprep.subr.bf16.mxu1 %v4873_v4  ;;  %v4912_v4 = vld [vmem:[#allocation8 + $0x2c4] ss:$16 sps:$4 sm:$0xff]  }
 0x153   :  { %2760 = vmatpush1.bf16.msra.mxu0 %v4868_v62  ;;  %v4901_v62 = vld [vmem:[#allocation8 + $0x288] ss:$16 sps:$4 sm:$0xff]  }
 0x154   :  { %2772 = vmatprep.subr.bf16.mxu0 %v4876_v63  ;;  %2932 = vmatpush1.bf16.msra.mxu1 %v4871_v5  ;;  %v4906_v63 = vld [vmem:[#allocation8 + $0x2a4] ss:$16 sps:$4 sm:$0xff]   ;;  %v4915_v5 = vld [vmem:[#allocation8 + $0x2cc] ss:$16 sps:$4 sm:$0xff]  }
 0x155   :  { %2944 = vmatprep.subr.bf16.mxu1 %v4879_v6  ;;  %v4910_v6 = vld [vmem:[#allocation8 + $0x2c0] ss:$16 sps:$4 sm:$0xff]  }
 0x1a9   :  { %v1009_v14 = vpop.f32.mrb[0].mxu0  ;;  %v1052_v36 = vpop.f32.mrb[0].mxu1 }
 0x1aa   :  { %v1010_v15 = vadd.f32 %v1009_v14, %v288_v12  ;;  %v1011_v16 = vpop.f32.mrb[1].mxu0  ;;  %v1053_v39 = vadd.f32 %v1052_v36, %v296_v32  ;;  %v1054_v40 = vpop.f32.mrb[1].mxu1  ;;  %v4916_v14 = vld [vmem:[#allocation8 + $0x2e0] ss:$16 sps:$4 sm:$0xff]  }
 0x1ab   :  { %v1012_v17 = vadd.f32 %v1011_v16, %v292_v13  ;;  %v1013_v18 = vpop.f32.mrb[2].mxu0  ;;  %v1055_v43 = vadd.f32 %v1054_v40, %v300_v35  ;;  %v1056_v44 = vpop.f32.mrb[2].mxu1  ;;  %v4924_v16 = vld [vmem:[#allocation8 + $0x304] ss:$16 sps:$4 sm:$0xff]   ;;  %v4946_v36 = vld [vmem:[#allocation8 + $0x380] ss:$16 sps:$4 sm:$0xff]  }
 0x1ac   :  { %v1014_v19 = vadd.f32 %v1013_v18, %v288_v12  ;;  %v1015_v20 = vpop.f32.mrb[3].mxu0  ;;  %v1147_v24 = vmax.f32 %v1010_v15, 0.0  ;;  %v1149_v45 = vmax.f32 %v1053_v39, 0.0  ;;  %v1057_v46 = vadd.f32 %v1056_v44, %v296_v32  ;;  %v1058_v47 = vpop.f32.mrb[3].mxu1  ;;  %v4918_v12 = vld [vmem:[#allocation8 + $0x2e4] ss:$16 sps:$4 sm:$0xff]  }
 0x1ad   :  { %v1016_v21 = vadd.f32 %v1015_v20, %v292_v13  ;;  %v1148_v27 = vmax.f32 %v1012_v17, 0.0  ;;  %v1150_v22 = vmax.f32 %v1055_v43, 0.0  ;;  %v1059_v48 = vadd.f32 %v1058_v47, %v300_v35  ;;  %v4921_v13 = vld [vmem:[#allocation8 + $0x2ec] ss:$16 sps:$4 sm:$0xff]   ;;  %v4919_v15 = vld [vmem:[#allocation8 + $0x2e8] ss:$16 sps:$4 sm:$0xff]  }
 0x1ae   :  { %v1155_v25 = vmax.f32 %v1014_v19, 0.0  ;;  %v1157_v51 = vmax.f32 %v1057_v46, 0.0  ;;  %v4927_v17 = vld [vmem:[#allocation8 + $0x30c] ss:$16 sps:$4 sm:$0xff]   ;;  %v4922_v18 = vld [vmem:[#allocation8 + $0x300] ss:$16 sps:$4 sm:$0xff]  }
 0x1af   :  { %v1156_v28 = vmax.f32 %v1016_v21, 0.0  ;;  %v1158_v54 = vmax.f32 %v1059_v48, 0.0  ;;  %v4925_v19 = vld [vmem:[#allocation8 + $0x308] ss:$16 sps:$4 sm:$0xff]   ;;  %v4930_v20 = vld [vmem:[#allocation8 + $0x324] ss:$16 sps:$4 sm:$0xff]  }
 0x1b0   :  { %v1163_v0 = vpack.c.bf16 %v1155_v25, %v1147_v24  ;;  %v5788_v55 = vpack.c.bf16 %v1157_v51, %v1149_v45  ;;  %v4933_v21 = vld [vmem:[#allocation8 + $0x32c] ss:$16 sps:$4 sm:$0xff]   ;;  %v4928_v24 = vld [vmem:[#allocation8 + $0x320] ss:$16 sps:$4 sm:$0xff]   ;;  %v4931_v25 = vld [vmem:[#allocation8 + $0x328] ss:$16 sps:$4 sm:$0xff]  }
 0x1b1   :  { %v1164_v29 = vpack.c.bf16 %v1156_v28, %v1148_v27  ;;  %v1166_v56 = vpack.c.bf16 %v1158_v54, %v1150_v22  ;;  %v4936_v27 = vld [vmem:[#allocation8 + $0x344] ss:$16 sps:$4 sm:$0xff]   ;;  %v4939_v28 = vld [vmem:[#allocation8 + $0x34c] ss:$16 sps:$4 sm:$0xff]   ;;  %v4940_v32 = vld [vmem:[#allocation8 + $0x360] ss:$16 sps:$4 sm:$0xff]  }
 0x1b2   :  { %v4951_v35 = vld [vmem:[#allocation8 + $0x38c] ss:$16 sps:$4 sm:$0xff]   ;;  %v303_v40 = vsub.s32 4, %v5766_v8  ;;  %v4955_v43 = vld [vmem:[#allocation8 + $0x3a8] ss:$16 sps:$4 sm:$0xff]  }
 0x1b3   :  { %2761 = vmatprep.mubr.bf16.mxu0 %v1164_v29  ;;  %2933 = vmatprep.mubr.bf16.mxu1 %v1164_v29  ;;  %v4937_v29 = vld [vmem:[#allocation8 + $0x348] ss:$16 sps:$4 sm:$0xff]   ;;  %v4957_v39 = vld [vmem:[#allocation8 + $0x3ac] ss:$16 sps:$4 sm:$0xff]   ;;  %v4960_v44 = vld [vmem:[#allocation8 + $0x3c4] ss:$16 sps:$4 sm:$0xff]  }
 0x1b4   :  { %2762 = vmatmul.mubr.bf16.vlgmr.msra.gmra.mrb[8].mxu0 %v1163_v0  ;;  %2934 = vmatmul.mubr.bf16.vlgmr.msra.gmra.mrb[8].mxu1 %v1163_v0  ;;  %v4934_v0 = vld [vmem:[#allocation8 + $0x340] ss:$16 sps:$4 sm:$0xff]   ;;  %v4963_v45 = vld [vmem:[#allocation8 + $0x3cc] ss:$16 sps:$4 sm:$0xff]   ;;  %v304_v46 = vrot.slane %v5771_v10, %v303_v40  ;;  %v4961_v48 = vld [vmem:[#allocation8 + $0x3c8] ss:$16 sps:$4 sm:$0xff]  }
 0x1b5   :  { %2773 = vmatpush1.bf16.msra.mxu0 %v4874_v30  ;;  %2945 = vmatpush1.bf16.msra.mxu1 %v4877_v31  ;;  %v4942_v30 = vld [vmem:[#allocation8 + $0x364] ss:$16 sps:$4 sm:$0xff]   ;;  %v4945_v31 = vld [vmem:[#allocation8 + $0x36c] ss:$16 sps:$4 sm:$0xff]   ;;  %v4958_v22 = vld [vmem:[#allocation8 + $0x3c0] ss:$16 sps:$4 sm:$0xff]  }
 0x1b6   :  { %2774 = vmatprep.subr.bf16.mxu0 %v4882_v33  ;;  %2946 = vmatprep.subr.bf16.mxu1 %v4885_v34  ;;  %v4943_v33 = vld [vmem:[#allocation8 + $0x368] ss:$16 sps:$4 sm:$0xff]   ;;  %v4948_v34 = vld [vmem:[#allocation8 + $0x384] ss:$16 sps:$4 sm:$0xff]   ;;  %v4969_v51 = vld [vmem:[#allocation8 + $0x3ec] ss:$16 sps:$4 sm:$0xff]  }
 0x1b7   :  { %2804 = vmatprep.mubr.bf16.mxu0 %v1166_v56  ;;  %2976 = vmatprep.mubr.bf16.mxu1 %v1166_v56 }
 0x1b9   :  { %2775 = vmatpush1.bf16.msra.mxu0 %v4880_v37  ;;  %2947 = vmatpush1.bf16.msra.mxu1 %v4883_v38  ;;  %v4949_v37 = vld [vmem:[#allocation8 + $0x388] ss:$16 sps:$4 sm:$0xff]   ;;  %v4954_v38 = vld [vmem:[#allocation8 + $0x3a4] ss:$16 sps:$4 sm:$0xff]  }
 0x1ba   :  { %2776 = vmatprep.subr.bf16.mxu0 %v4888_v41  ;;  %2948 = vmatprep.subr.bf16.mxu1 %v4891_v42  ;;  %v307_v41 = vsub.s32 5, %v5766_v8  ;;  %v4952_v42 = vld [vmem:[#allocation8 + $0x3a0] ss:$16 sps:$4 sm:$0xff]  }
 0x1bc   :  { %v308_v47 = vrot.slane %v5771_v10, %v307_v41  ;;  %v4988_v41 = vld [vmem:[#allocation8 + $0x460] ss:$16 sps:$4 sm:$0xff]  }
 0x1bd   :  { %2777 = vmatpush1.bf16.msra.mxu0 %v4886_v49  ;;  %2949 = vmatpush1.bf16.msra.mxu1 %v4889_v50  ;;  %v4966_v50 = vld [vmem:[#allocation8 + $0x3e4] ss:$16 sps:$4 sm:$0xff]  }
 0x1be   :  { %2778 = vmatprep.subr.bf16.mxu0 %v4894_v52  ;;  %2950 = vmatprep.subr.bf16.mxu1 %v4897_v53 }
 0x1c1   :  { %2779 = vmatpush1.bf16.msra.mxu0 %v4892_v57  ;;  %2951 = vmatpush1.bf16.msra.mxu1 %v4895_v58 }
 0x1c2   :  { %2780 = vmatprep.subr.bf16.mxu0 %v4900_v59  ;;  %2952 = vmatprep.subr.bf16.mxu1 %v4903_v60  ;;  %v4964_v60 = vld [vmem:[#allocation8 + $0x3e0] ss:$16 sps:$4 sm:$0xff]  }
 0x1c5   :  { %2781 = vmatpush1.bf16.msra.mxu0 %v4898_v61  ;;  %2953 = vmatpush1.bf16.msra.mxu1 %v4901_v62  ;;  %v4967_v61 = vld [vmem:[#allocation8 + $0x3e8] ss:$16 sps:$4 sm:$0xff]  }
 0x1c6   :  { %2782 = vmatprep.subr.bf16.mxu0 %v4906_v63  ;;  %2954 = vmatprep.subr.bf16.mxu1 %v4909_v1  ;;  %v311_v1 = vsub.s32 6, %v5766_v8 }
 0x1c9   :  { %2783 = vmatpush1.bf16.msra.mxu0 %v4904_v2  ;;  %2955 = vmatpush1.bf16.msra.mxu1 %v4907_v3  ;;  %v4972_v2 = vld [vmem:[#allocation8 + $0x404] ss:$16 sps:$4 sm:$0xff]   ;;  %v4975_v3 = vld [vmem:[#allocation8 + $0x40c] ss:$16 sps:$4 sm:$0xff]  }
 0x1ca   :  { %2784 = vmatprep.subr.bf16.mxu0 %v4912_v4  ;;  %2956 = vmatprep.subr.bf16.mxu1 %v4915_v5  ;;  %v315_v5 = vsub.s32 7, %v5766_v8 }
 0x1cd   :  { %2785 = vmatpush1.bf16.msra.mxu0 %v4910_v6  ;;  %2957 = vmatpush1.bf16.msra.mxu1 %v4913_v7 }
 0x1ce   :  { %2786 = vmatprep.subr.bf16.mxu0 %v4918_v12  ;;  %2958 = vmatprep.subr.bf16.mxu1 %v4921_v13  ;;  %v4970_v12 = vld [vmem:[#allocation8 + $0x400] ss:$16 sps:$4 sm:$0xff]   ;;  %v4973_v13 = vld [vmem:[#allocation8 + $0x408] ss:$16 sps:$4 sm:$0xff]  }
 0x1d1   :  { %2787 = vmatpush1.bf16.msra.mxu0 %v4916_v14  ;;  %2959 = vmatpush1.bf16.msra.mxu1 %v4919_v15  ;;  %v312_v15 = vrot.slane %v5771_v10, %v311_v1  ;;  %v5029_v1 = vld [vmem:[#allocation8 + $0x52c] ss:$16 sps:$4 sm:$0xff]  }
 0x1d2   :  { %2788 = vmatprep.subr.bf16.mxu0 %v4924_v16  ;;  %2960 = vmatprep.subr.bf16.mxu1 %v4927_v17  ;;  %v4978_v16 = vld [vmem:[#allocation8 + $0x424] ss:$16 sps:$4 sm:$0xff]   ;;  %v4981_v17 = vld [vmem:[#allocation8 + $0x42c] ss:$16 sps:$4 sm:$0xff]  }
 0x1d5   :  { %2789 = vmatpush1.bf16.msra.mxu0 %v4922_v18  ;;  %2961 = vmatpush1.bf16.msra.mxu1 %v4925_v19  ;;  %v316_v18 = vrot.slane %v5771_v10, %v315_v5  ;;  %v5035_v5 = vld [vmem:[#allocation8 + $0x54c] ss:$16 sps:$4 sm:$0xff]  }
 0x1d6   :  { %2790 = vmatprep.subr.bf16.mxu0 %v4930_v20  ;;  %2962 = vmatprep.subr.bf16.mxu1 %v4933_v21  ;;  %v4976_v20 = vld [vmem:[#allocation8 + $0x420] ss:$16 sps:$4 sm:$0xff]   ;;  %v4979_v21 = vld [vmem:[#allocation8 + $0x428] ss:$16 sps:$4 sm:$0xff]  }
 0x1d9   :  { %2791 = vmatpush1.bf16.msra.mxu0 %v4928_v24  ;;  %2963 = vmatpush1.bf16.msra.mxu1 %v4931_v25 }
 0x1da   :  { %2792 = vmatprep.subr.bf16.mxu0 %v4936_v27  ;;  %2964 = vmatprep.subr.bf16.mxu1 %v4939_v28  ;;  %v4984_v27 = vld [vmem:[#allocation8 + $0x444] ss:$16 sps:$4 sm:$0xff]   ;;  %v4987_v28 = vld [vmem:[#allocation8 + $0x44c] ss:$16 sps:$4 sm:$0xff]  }
 0x1dd   :  { %2793 = vmatpush1.bf16.msra.mxu0 %v4934_v0  ;;  %2965 = vmatpush1.bf16.msra.mxu1 %v4937_v29 }
 0x1de   :  { %2794 = vmatprep.subr.bf16.mxu0 %v4942_v30  ;;  %2966 = vmatprep.subr.bf16.mxu1 %v4945_v31 }
 0x1e1   :  { %2795 = vmatpush1.bf16.msra.mxu0 %v4940_v32  ;;  %2967 = vmatpush1.bf16.msra.mxu1 %v4943_v33  ;;  %v4982_v33 = vld [vmem:[#allocation8 + $0x440] ss:$16 sps:$4 sm:$0xff]  }
 0x1e2   :  { %2796 = vmatprep.subr.bf16.mxu0 %v4948_v34  ;;  %2968 = vmatprep.subr.bf16.mxu1 %v4951_v35  ;;  %v4985_v34 = vld [vmem:[#allocation8 + $0x448] ss:$16 sps:$4 sm:$0xff]  }
 0x1e5   :  { %2797 = vmatpush1.bf16.msra.mxu0 %v4946_v36  ;;  %2969 = vmatpush1.bf16.msra.mxu1 %v4949_v37  ;;  %v4990_v36 = vld [vmem:[#allocation8 + $0x464] ss:$16 sps:$4 sm:$0xff]   ;;  %v4993_v37 = vld [vmem:[#allocation8 + $0x46c] ss:$16 sps:$4 sm:$0xff]  }
 0x1e6   :  { %2798 = vmatprep.subr.bf16.mxu0 %v4954_v38  ;;  %2970 = vmatprep.subr.bf16.mxu1 %v4957_v39 }
 0x1e9   :  { %2799 = vmatpush1.bf16.msra.mxu0 %v4952_v42  ;;  %2971 = vmatpush1.bf16.msra.mxu1 %v4955_v43  ;;  %v1095_v49 = vpop.f32.mrb[4].mxu0  ;;  %v4991_v42 = vld [vmem:[#allocation8 + $0x468] ss:$16 sps:$4 sm:$0xff]   ;;  %v4996_v43 = vld [vmem:[#allocation8 + $0x484] ss:$16 sps:$4 sm:$0xff]  }
 0x1ea   :  { %2800 = vmatprep.subr.bf16.mxu0 %v4960_v44  ;;  %2972 = vmatprep.subr.bf16.mxu1 %v4963_v45  ;;  %v1096_v52 = vadd.f32 %v1095_v49, %v304_v46  ;;  %v1097_v53 = vpop.f32.mrb[5].mxu0  ;;  %v1138_v19 = vpop.f32.mrb[4].mxu1  ;;  %v4999_v44 = vld [vmem:[#allocation8 + $0x48c] ss:$16 sps:$4 sm:$0xff]   ;;  %v4994_v45 = vld [vmem:[#allocation8 + $0x480] ss:$16 sps:$4 sm:$0xff]  }
 0x1eb   :  { %v1098_v54 = vadd.f32 %v1097_v53, %v308_v47  ;;  %v1099_v56 = vpop.f32.mrb[6].mxu0  ;;  %v1139_v24 = vadd.f32 %v1138_v19, %v312_v15  ;;  %v1140_v25 = vpop.f32.mrb[5].mxu1  ;;  %v5003_v49 = vld [vmem:[#allocation8 + $0x4a8] ss:$16 sps:$4 sm:$0xff]   ;;  %v5042_v19 = vld [vmem:[#allocation8 + $0x580] ss:$16 sps:$4 sm:$0xff]  }
 0x1ec   :  { %v1151_v57 = vmax.f32 %v1096_v52, 0.0  ;;  %v1100_v58 = vadd.f32 %v1099_v56, %v304_v46  ;;  %v1101_v59 = vpop.f32.mrb[7].mxu0  ;;  %v1141_v0 = vadd.f32 %v1140_v25, %v316_v18  ;;  %v1142_v29 = vpop.f32.mrb[6].mxu1  ;;  %v4997_v46 = vld [vmem:[#allocation8 + $0x488] ss:$16 sps:$4 sm:$0xff]  }
 0x1ed   :  { %2801 = vmatpush1.bf16.msra.mxu0 %v4958_v22  ;;  %2973 = vmatpush1.bf16.msra.mxu1 %v4961_v48  ;;  %v1152_v62 = vmax.f32 %v1098_v54, 0.0  ;;  %v1102_v63 = vadd.f32 %v1101_v59, %v308_v47  ;;  %v1153_v10 = vmax.f32 %v1139_v24, 0.0  ;;  %v1143_v30 = vadd.f32 %v1142_v29, %v312_v15  ;;  %v1144_v31 = vpop.f32.mrb[7].mxu1  ;;  %v5002_v47 = vld [vmem:[#allocation8 + $0x4a4] ss:$16 sps:$4 sm:$0xff]  }
 0x1ee   :  { %2802 = vmatprep.subr.bf16.mxu0 %v4966_v50  ;;  %2974 = vmatprep.subr.bf16.mxu1 %v4969_v51  ;;  %v1159_v4 = vmax.f32 %v1100_v58, 0.0  ;;  %v1154_v32 = vmax.f32 %v1141_v0, 0.0  ;;  %v5005_v22 = vld [vmem:[#allocation8 + $0x4ac] ss:$16 sps:$4 sm:$0xff]   ;;  %v5000_v48 = vld [vmem:[#allocation8 + $0x4a0] ss:$16 sps:$4 sm:$0xff]  }
 0x1ef   :  { %v1160_v6 = vmax.f32 %v1102_v63, 0.0  ;;  %v1161_v35 = vmax.f32 %v1143_v30, 0.0  ;;  %v5008_v50 = vld [vmem:[#allocation8 + $0x4c4] ss:$16 sps:$4 sm:$0xff]   ;;  %v5011_v51 = vld [vmem:[#allocation8 + $0x4cc] ss:$16 sps:$4 sm:$0xff]  }
 0x1f0   :  { %v5796_v7 = vpack.c.bf16 %v1159_v4, %v1151_v57  ;;  %v5006_v52 = vld [vmem:[#allocation8 + $0x4c0] ss:$16 sps:$4 sm:$0xff]   ;;  %v5009_v53 = vld [vmem:[#allocation8 + $0x4c8] ss:$16 sps:$4 sm:$0xff]   ;;  %v5014_v54 = vld [vmem:[#allocation8 + $0x4e4] ss:$16 sps:$4 sm:$0xff]  }
 0x1f1   :  { %2803 = vmatpush1.bf16.msra.mxu0 %v4964_v60  ;;  %2975 = vmatpush1.bf16.msra.mxu1 %v4967_v61  ;;  %v1168_v14 = vpack.c.bf16 %v1160_v6, %v1152_v62  ;;  %v5802_v39 = vpack.c.bf16 %v1161_v35, %v1153_v10  ;;  %v5017_v56 = vld [vmem:[#allocation8 + $0x4ec] ss:$16 sps:$4 sm:$0xff]   ;;  %v5012_v57 = vld [vmem:[#allocation8 + $0x4e0] ss:$16 sps:$4 sm:$0xff]   ;;  %v5015_v58 = vld [vmem:[#allocation8 + $0x4e8] ss:$16 sps:$4 sm:$0xff]  }
 0x1f2   :  { %2815 = vmatprep.subr.bf16.mxu0 %v4972_v2  ;;  %2987 = vmatprep.subr.bf16.mxu1 %v4975_v3  ;;  %v5020_v59 = vld [vmem:[#allocation8 + $0x504] ss:$16 sps:$4 sm:$0xff]   ;;  %v5023_v60 = vld [vmem:[#allocation8 + $0x50c] ss:$16 sps:$4 sm:$0xff]   ;;  %v5018_v61 = vld [vmem:[#allocation8 + $0x500] ss:$16 sps:$4 sm:$0xff]  }
 0x1f3   :  { %v5021_v62 = vld [vmem:[#allocation8 + $0x508] ss:$16 sps:$4 sm:$0xff]   ;;  %v5026_v63 = vld [vmem:[#allocation8 + $0x524] ss:$16 sps:$4 sm:$0xff]   ;;  %v5024_v2 = vld [vmem:[#allocation8 + $0x520] ss:$16 sps:$4 sm:$0xff]  }
 0x1f4   :  { %2805 = vmatmul.mubr.bf16.vlgmr.msra.gmra.mrb[8].mxu0 %v5788_v55  ;;  %2977 = vmatmul.mubr.bf16.vlgmr.msra.gmra.mrb[8].mxu1 %v5788_v55  ;;  %v1145_v55 = vadd.f32 %v1144_v31, %v316_v18  ;;  %v5027_v3 = vld [vmem:[#allocation8 + $0x528] ss:$16 sps:$4 sm:$0xff]   ;;  %v5032_v4 = vld [vmem:[#allocation8 + $0x544] ss:$16 sps:$4 sm:$0xff]   ;;  %v5030_v6 = vld [vmem:[#allocation8 + $0x540] ss:$16 sps:$4 sm:$0xff]  }
 0x1f5   :  { %2816 = vmatpush1.bf16.msra.mxu0 %v4970_v12  ;;  %2988 = vmatpush1.bf16.msra.mxu1 %v4973_v13  ;;  %v5033_v12 = vld [vmem:[#allocation8 + $0x548] ss:$16 sps:$4 sm:$0xff]   ;;  %v5038_v13 = vld [vmem:[#allocation8 + $0x564] ss:$16 sps:$4 sm:$0xff]   ;;  %v5036_v15 = vld [vmem:[#allocation8 + $0x560] ss:$16 sps:$4 sm:$0xff]  }
 0x1f6   :  { %2817 = vmatprep.subr.bf16.mxu0 %v4978_v16  ;;  %2989 = vmatprep.subr.bf16.mxu1 %v4981_v17  ;;  %v1162_v38 = vmax.f32 %v1145_v55, 0.0  ;;  %v5039_v16 = vld [vmem:[#allocation8 + $0x568] ss:$16 sps:$4 sm:$0xff]   ;;  %v5044_v17 = vld [vmem:[#allocation8 + $0x584] ss:$16 sps:$4 sm:$0xff]  }
 0x1f7   :  { %2847 = vmatprep.mubr.bf16.mxu0 %v1168_v14  ;;  %3019 = vmatprep.mubr.bf16.mxu1 %v1168_v14  ;;  %v5041_v14 = vld [vmem:[#allocation8 + $0x56c] ss:$16 sps:$4 sm:$0xff]   ;;  %v5048_v25 = vld [vmem:[#allocation8 + $0x5a0] ss:$16 sps:$4 sm:$0xff]   ;;  %v5057_v10 = vld [vmem:[#allocation8 + $0x5c8] ss:$16 sps:$4 sm:$0xff]  }
 0x1f8   :  { %v5804_v40 = vpack.c.bf16 %v1162_v38, %v1154_v32  ;;  %v5047_v18 = vld [vmem:[#allocation8 + $0x58c] ss:$16 sps:$4 sm:$0xff]   ;;  %v5054_v29 = vld [vmem:[#allocation8 + $0x5c0] ss:$16 sps:$4 sm:$0xff]   ;;  %v5062_v30 = vld [vmem:[#allocation8 + $0x5e4] ss:$16 sps:$4 sm:$0xff]  }
 0x1f9   :  { %2818 = vmatpush1.bf16.msra.mxu0 %v4976_v20  ;;  %2990 = vmatpush1.bf16.msra.mxu1 %v4979_v21  ;;  %v5045_v20 = vld [vmem:[#allocation8 + $0x588] ss:$16 sps:$4 sm:$0xff]   ;;  %v5050_v21 = vld [vmem:[#allocation8 + $0x5a4] ss:$16 sps:$4 sm:$0xff]   ;;  %v5053_v24 = vld [vmem:[#allocation8 + $0x5ac] ss:$16 sps:$4 sm:$0xff]  }
 0x1fa   :  { %2819 = vmatprep.subr.bf16.mxu0 %v4984_v27  ;;  %2991 = vmatprep.subr.bf16.mxu1 %v4987_v28  ;;  %v5051_v27 = vld [vmem:[#allocation8 + $0x5a8] ss:$16 sps:$4 sm:$0xff]   ;;  %v5056_v28 = vld [vmem:[#allocation8 + $0x5c4] ss:$16 sps:$4 sm:$0xff]   ;;  %v5059_v0 = vld [vmem:[#allocation8 + $0x5cc] ss:$16 sps:$4 sm:$0xff]  }
 0x1fb   :  { %v5065_v31 = vld [vmem:[#allocation8 + $0x5ec] ss:$16 sps:$4 sm:$0xff]   ;;  %v5060_v32 = vld [vmem:[#allocation8 + $0x5e0] ss:$16 sps:$4 sm:$0xff]   ;;  %v5063_v55 = vld [vmem:[#allocation8 + $0x5e8] ss:$16 sps:$4 sm:$0xff]  }
 0x1fc   :  { %v5066_v35 = vld [vmem:[#allocation8 + $0x600] ss:$16 sps:$4 sm:$0xff]   ;;  %v5077_v38 = vld [vmem:[#allocation8 + $0x62c] ss:$16 sps:$4 sm:$0xff]  }
 0x1fd   :  { %2820 = vmatpush1.bf16.msra.mxu0 %v4982_v33  ;;  %2992 = vmatpush1.bf16.msra.mxu1 %v4985_v34  ;;  %v5068_v33 = vld [vmem:[#allocation8 + $0x604] ss:$16 sps:$4 sm:$0xff]   ;;  %v5071_v34 = vld [vmem:[#allocation8 + $0x60c] ss:$16 sps:$4 sm:$0xff]  }
 0x1fe   :  { %2821 = vmatprep.subr.bf16.mxu0 %v4990_v36  ;;  %2993 = vmatprep.subr.bf16.mxu1 %v4993_v37  ;;  %v5069_v36 = vld [vmem:[#allocation8 + $0x608] ss:$16 sps:$4 sm:$0xff]   ;;  %v5074_v37 = vld [vmem:[#allocation8 + $0x624] ss:$16 sps:$4 sm:$0xff]  }
 0x201   :  { %2822 = vmatpush1.bf16.msra.mxu0 %v4988_v41  ;;  %2994 = vmatpush1.bf16.msra.mxu1 %v4991_v42  ;;  %v5072_v41 = vld [vmem:[#allocation8 + $0x620] ss:$16 sps:$4 sm:$0xff]   ;;  %v5075_v42 = vld [vmem:[#allocation8 + $0x628] ss:$16 sps:$4 sm:$0xff]  }
 0x202   :  { %2823 = vmatprep.subr.bf16.mxu0 %v4996_v43  ;;  %2995 = vmatprep.subr.bf16.mxu1 %v4999_v44  ;;  %v5080_v43 = vld [vmem:[#allocation8 + $0x644] ss:$16 sps:$4 sm:$0xff]   ;;  %v5083_v44 = vld [vmem:[#allocation8 + $0x64c] ss:$16 sps:$4 sm:$0xff]  }
 0x205   :  { %2824 = vmatpush1.bf16.msra.mxu0 %v4994_v45  ;;  %2996 = vmatpush1.bf16.msra.mxu1 %v4997_v46  ;;  %v5078_v45 = vld [vmem:[#allocation8 + $0x640] ss:$16 sps:$4 sm:$0xff]   ;;  %v5081_v46 = vld [vmem:[#allocation8 + $0x648] ss:$16 sps:$4 sm:$0xff]  }
 0x206   :  { %2825 = vmatprep.subr.bf16.mxu0 %v5002_v47  ;;  %2997 = vmatprep.subr.bf16.mxu1 %v5005_v22  ;;  %v5086_v47 = vld [vmem:[#allocation8 + $0x664] ss:$16 sps:$4 sm:$0xff]   ;;  %v5084_v22 = vld [vmem:[#allocation8 + $0x660] ss:$16 sps:$4 sm:$0xff]  }
 0x209   :  { %2826 = vmatpush1.bf16.msra.mxu0 %v5000_v48  ;;  %2998 = vmatpush1.bf16.msra.mxu1 %v5003_v49  ;;  %v5087_v48 = vld [vmem:[#allocation8 + $0x668] ss:$16 sps:$4 sm:$0xff]   ;;  %v5092_v49 = vld [vmem:[#allocation8 + $0x684] ss:$16 sps:$4 sm:$0xff]  }
 0x20a   :  { %2827 = vmatprep.subr.bf16.mxu0 %v5008_v50  ;;  %2999 = vmatprep.subr.bf16.mxu1 %v5011_v51  ;;  %v5095_v50 = vld [vmem:[#allocation8 + $0x68c] ss:$16 sps:$4 sm:$0xff]   ;;  %v5090_v51 = vld [vmem:[#allocation8 + $0x680] ss:$16 sps:$4 sm:$0xff]  }
 0x20d   :  { %2828 = vmatpush1.bf16.msra.mxu0 %v5006_v52  ;;  %3000 = vmatpush1.bf16.msra.mxu1 %v5009_v53  ;;  %v5098_v52 = vld [vmem:[#allocation8 + $0x6a4] ss:$16 sps:$4 sm:$0xff]   ;;  %v5101_v53 = vld [vmem:[#allocation8 + $0x6ac] ss:$16 sps:$4 sm:$0xff]  }
 0x20e   :  { %2829 = vmatprep.subr.bf16.mxu0 %v5014_v54  ;;  %3001 = vmatprep.subr.bf16.mxu1 %v5017_v56  ;;  %v5096_v54 = vld [vmem:[#allocation8 + $0x6a0] ss:$16 sps:$4 sm:$0xff]   ;;  %v5099_v56 = vld [vmem:[#allocation8 + $0x6a8] ss:$16 sps:$4 sm:$0xff]  }
 0x211   :  { %2830 = vmatpush1.bf16.msra.mxu0 %v5012_v57  ;;  %3002 = vmatpush1.bf16.msra.mxu1 %v5015_v58  ;;  %v5104_v57 = vld [vmem:[#allocation8 + $0x6c4] ss:$16 sps:$4 sm:$0xff]   ;;  %v5107_v58 = vld [vmem:[#allocation8 + $0x6cc] ss:$16 sps:$4 sm:$0xff]  }
 0x212   :  { %2831 = vmatprep.subr.bf16.mxu0 %v5020_v59  ;;  %3003 = vmatprep.subr.bf16.mxu1 %v5023_v60  ;;  %v5102_v59 = vld [vmem:[#allocation8 + $0x6c0] ss:$16 sps:$4 sm:$0xff]   ;;  %v5105_v60 = vld [vmem:[#allocation8 + $0x6c8] ss:$16 sps:$4 sm:$0xff]  }
 0x215   :  { %2832 = vmatpush1.bf16.msra.mxu0 %v5018_v61  ;;  %3004 = vmatpush1.bf16.msra.mxu1 %v5021_v62  ;;  %v5110_v61 = vld [vmem:[#allocation8 + $0x6e4] ss:$16 sps:$4 sm:$0xff]   ;;  %v5113_v62 = vld [vmem:[#allocation8 + $0x6ec] ss:$16 sps:$4 sm:$0xff]  }
 0x216   :  { %2833 = vmatprep.subr.bf16.mxu0 %v5026_v63  ;;  %3005 = vmatprep.subr.bf16.mxu1 %v5029_v1  ;;  %v5108_v63 = vld [vmem:[#allocation8 + $0x6e0] ss:$16 sps:$4 sm:$0xff]   ;;  %v5111_v1 = vld [vmem:[#allocation8 + $0x6e8] ss:$16 sps:$4 sm:$0xff]  }
 0x219   :  { %2834 = vmatpush1.bf16.msra.mxu0 %v5024_v2  ;;  %3006 = vmatpush1.bf16.msra.mxu1 %v5027_v3  ;;  %v5116_v2 = vld [vmem:[#allocation8 + $0x704] ss:$16 sps:$4 sm:$0xff]   ;;  %v5119_v3 = vld [vmem:[#allocation8 + $0x70c] ss:$16 sps:$4 sm:$0xff]  }
 0x21a   :  { %2835 = vmatprep.subr.bf16.mxu0 %v5032_v4  ;;  %3007 = vmatprep.subr.bf16.mxu1 %v5035_v5  ;;  %v5114_v4 = vld [vmem:[#allocation8 + $0x700] ss:$16 sps:$4 sm:$0xff]   ;;  %v5117_v5 = vld [vmem:[#allocation8 + $0x708] ss:$16 sps:$4 sm:$0xff]  }
 0x21d   :  { %2836 = vmatpush1.bf16.msra.mxu0 %v5030_v6  ;;  %3008 = vmatpush1.bf16.msra.mxu1 %v5033_v12  ;;  %v5122_v6 = vld [vmem:[#allocation8 + $0x724] ss:$16 sps:$4 sm:$0xff]   ;;  %v5125_v12 = vld [vmem:[#allocation8 + $0x72c] ss:$16 sps:$4 sm:$0xff]  }
 0x21e   :  { %2837 = vmatprep.subr.bf16.mxu0 %v5038_v13  ;;  %3009 = vmatprep.subr.bf16.mxu1 %v5041_v14  ;;  %v5120_v13 = vld [vmem:[#allocation8 + $0x720] ss:$16 sps:$4 sm:$0xff]   ;;  %v5123_v14 = vld [vmem:[#allocation8 + $0x728] ss:$16 sps:$4 sm:$0xff]  }
 0x221   :  { %2838 = vmatpush1.bf16.msra.mxu0 %v5036_v15  ;;  %3010 = vmatpush1.bf16.msra.mxu1 %v5039_v16  ;;  %v5128_v15 = vld [vmem:[#allocation8 + $0x744] ss:$16 sps:$4 sm:$0xff]   ;;  %v5131_v16 = vld [vmem:[#allocation8 + $0x74c] ss:$16 sps:$4 sm:$0xff]  }
 0x222   :  { %2839 = vmatprep.subr.bf16.mxu0 %v5044_v17  ;;  %3011 = vmatprep.subr.bf16.mxu1 %v5047_v18  ;;  %v5126_v17 = vld [vmem:[#allocation8 + $0x740] ss:$16 sps:$4 sm:$0xff]   ;;  %v5129_v18 = vld [vmem:[#allocation8 + $0x748] ss:$16 sps:$4 sm:$0xff]  }
 0x225   :  { %2840 = vmatpush1.bf16.msra.mxu0 %v5042_v19  ;;  %3012 = vmatpush1.bf16.msra.mxu1 %v5045_v20  ;;  %v5134_v19 = vld [vmem:[#allocation8 + $0x764] ss:$16 sps:$4 sm:$0xff]   ;;  %v5137_v20 = vld [vmem:[#allocation8 + $0x76c] ss:$16 sps:$4 sm:$0xff]  }
 0x226   :  { %2841 = vmatprep.subr.bf16.mxu0 %v5050_v21  ;;  %3013 = vmatprep.subr.bf16.mxu1 %v5053_v24  ;;  %v5132_v21 = vld [vmem:[#allocation8 + $0x760] ss:$16 sps:$4 sm:$0xff]   ;;  %v5135_v24 = vld [vmem:[#allocation8 + $0x768] ss:$16 sps:$4 sm:$0xff]  }
 0x229   :  { %2842 = vmatpush1.bf16.msra.mxu0 %v5048_v25  ;;  %3014 = vmatpush1.bf16.msra.mxu1 %v5051_v27  ;;  %v5140_v25 = vld [vmem:[#allocation8 + $0x784] ss:$16 sps:$4 sm:$0xff]   ;;  %v5143_v27 = vld [vmem:[#allocation8 + $0x78c] ss:$16 sps:$4 sm:$0xff]  }
 0x22a   :  { %2843 = vmatprep.subr.bf16.mxu0 %v5056_v28  ;;  %3015 = vmatprep.subr.bf16.mxu1 %v5059_v0  ;;  %v5138_v28 = vld [vmem:[#allocation8 + $0x780] ss:$16 sps:$4 sm:$0xff]   ;;  %v5141_v0 = vld [vmem:[#allocation8 + $0x788] ss:$16 sps:$4 sm:$0xff]  }
 0x22d   :  { %2844 = vmatpush1.bf16.msra.mxu0 %v5054_v29  ;;  %3016 = vmatpush1.bf16.msra.mxu1 %v5057_v10  ;;  %v5146_v29 = vld [vmem:[#allocation8 + $0x7a4] ss:$16 sps:$4 sm:$0xff]   ;;  %v5149_v10 = vld [vmem:[#allocation8 + $0x7ac] ss:$16 sps:$4 sm:$0xff]  }
 0x22e   :  { %2845 = vmatprep.subr.bf16.mxu0 %v5062_v30  ;;  %3017 = vmatprep.subr.bf16.mxu1 %v5065_v31  ;;  %v5144_v30 = vld [vmem:[#allocation8 + $0x7a0] ss:$16 sps:$4 sm:$0xff]   ;;  %v5147_v31 = vld [vmem:[#allocation8 + $0x7a8] ss:$16 sps:$4 sm:$0xff]  }
 0x231   :  { %2846 = vmatpush1.bf16.msra.mxu0 %v5060_v32  ;;  %3018 = vmatpush1.bf16.msra.mxu1 %v5063_v55  ;;  %v5152_v32 = vld [vmem:[#allocation8 + $0x7c4] ss:$16 sps:$4 sm:$0xff]   ;;  %v5155_v55 = vld [vmem:[#allocation8 + $0x7cc] ss:$16 sps:$4 sm:$0xff]  }
 0x232   :  { %2858 = vmatprep.subr.bf16.mxu0 %v5068_v33  ;;  %3030 = vmatprep.subr.bf16.mxu1 %v5071_v34  ;;  %v5150_v33 = vld [vmem:[#allocation8 + $0x7c0] ss:$16 sps:$4 sm:$0xff]   ;;  %v5153_v34 = vld [vmem:[#allocation8 + $0x7c8] ss:$16 sps:$4 sm:$0xff]  }
 0x234   :  { %2848 = vmatmul.mubr.bf16.vlgmr.msra.gmra.mrb[8].mxu0 %v5796_v7  ;;  %3020 = vmatmul.mubr.bf16.vlgmr.msra.gmra.mrb[8].mxu1 %v5796_v7  ;;  %v5089_v7 = vld [vmem:[#allocation8 + $0x66c] ss:$16 sps:$4 sm:$0xff]  }
 0x235   :  { %2859 = vmatpush1.bf16.msra.mxu0 %v5066_v35  ;;  %3031 = vmatpush1.bf16.msra.mxu1 %v5069_v36  ;;  %v5158_v35 = vld [vmem:[#allocation8 + $0x7e4] ss:$16 sps:$4 sm:$0xff]   ;;  %v5161_v36 = vld [vmem:[#allocation8 + $0x7ec] ss:$16 sps:$4 sm:$0xff]  }
 0x236   :  { %2860 = vmatprep.subr.bf16.mxu0 %v5074_v37  ;;  %3032 = vmatprep.subr.bf16.mxu1 %v5077_v38  ;;  %v5156_v37 = vld [vmem:[#allocation8 + $0x7e0] ss:$16 sps:$4 sm:$0xff]   ;;  %v5159_v38 = vld [vmem:[#allocation8 + $0x7e8] ss:$16 sps:$4 sm:$0xff]  }
 0x237   :  { %2890 = vmatprep.mubr.bf16.mxu0 %v5804_v40  ;;  %3062 = vmatprep.mubr.bf16.mxu1 %v5804_v40  ;;  %v5093_v40 = vld [vmem:[#allocation8 + $0x688] ss:$16 sps:$4 sm:$0xff]  }
 0x239   :  { %2861 = vmatpush1.bf16.msra.mxu0 %v5072_v41  ;;  %3033 = vmatpush1.bf16.msra.mxu1 %v5075_v42  ;;  %v5164_v41 = vld [vmem:[#allocation10 + $0x4] ss:$8 sps:$4 sm:$0xff]   ;;  %v5162_v42 = vld [vmem:[#allocation10] ss:$8 sps:$4 sm:$0xff]  }
 0x23a   :  { %2862 = vmatprep.subr.bf16.mxu0 %v5080_v43  ;;  %3034 = vmatprep.subr.bf16.mxu1 %v5083_v44  ;;  %v5167_v43 = vld [vmem:[#allocation10 + $0x14] ss:$8 sps:$4 sm:$0xff]   ;;  %v5165_v44 = vld [vmem:[#allocation10 + $0x10] ss:$8 sps:$4 sm:$0xff]  }
 0x23d   :  { %2863 = vmatpush1.bf16.msra.mxu0 %v5078_v45  ;;  %3035 = vmatpush1.bf16.msra.mxu1 %v5081_v46  ;;  %v5170_v45 = vld [vmem:[#allocation10 + $0x24] ss:$8 sps:$4 sm:$0xff]   ;;  %v5168_v46 = vld [vmem:[#allocation10 + $0x20] ss:$8 sps:$4 sm:$0xff]  }
 0x23e   :  { %2864 = vmatprep.subr.bf16.mxu0 %v5086_v47  ;;  %3036 = vmatprep.subr.bf16.mxu1 %v5089_v7  ;;  %v5173_v47 = vld [vmem:[#allocation10 + $0x34] ss:$8 sps:$4 sm:$0xff]   ;;  %v5171_v7 = vld [vmem:[#allocation10 + $0x30] ss:$8 sps:$4 sm:$0xff]  }
 0x241   :  { %2865 = vmatpush1.bf16.msra.mxu0 %v5084_v22  ;;  %3037 = vmatpush1.bf16.msra.mxu1 %v5087_v48  ;;  %v5176_v22 = vld [vmem:[#allocation10 + $0x44] ss:$8 sps:$4 sm:$0xff]   ;;  %v5174_v48 = vld [vmem:[#allocation10 + $0x40] ss:$8 sps:$4 sm:$0xff]  }
 0x242   :  { %2866 = vmatprep.subr.bf16.mxu0 %v5092_v49  ;;  %3038 = vmatprep.subr.bf16.mxu1 %v5095_v50  ;;  %v5179_v49 = vld [vmem:[#allocation10 + $0x54] ss:$8 sps:$4 sm:$0xff]   ;;  %v5177_v50 = vld [vmem:[#allocation10 + $0x50] ss:$8 sps:$4 sm:$0xff]  }
 0x245   :  { %2867 = vmatpush1.bf16.msra.mxu0 %v5090_v51  ;;  %3039 = vmatpush1.bf16.msra.mxu1 %v5093_v40  ;;  %v5180_v51 = vld [vmem:[#allocation10 + $0x60] ss:$8 sps:$4 sm:$0xff]   ;;  %v5185_v40 = vld [vmem:[#allocation10 + $0x74] ss:$8 sps:$4 sm:$0xff]  }
 0x246   :  { %2868 = vmatprep.subr.bf16.mxu0 %v5098_v52  ;;  %3040 = vmatprep.subr.bf16.mxu1 %v5101_v53  ;;  %v5183_v52 = vld [vmem:[#allocation10 + $0x70] ss:$8 sps:$4 sm:$0xff]   ;;  %v5188_v53 = vld [vmem:[#allocation10 + $0x84] ss:$8 sps:$4 sm:$0xff]  }
 0x249   :  { %2869 = vmatpush1.bf16.msra.mxu0 %v5096_v54  ;;  %3041 = vmatpush1.bf16.msra.mxu1 %v5099_v56  ;;  %v5186_v54 = vld [vmem:[#allocation10 + $0x80] ss:$8 sps:$4 sm:$0xff]   ;;  %v5191_v56 = vld [vmem:[#allocation10 + $0x94] ss:$8 sps:$4 sm:$0xff]  }
 0x24a   :  { %2870 = vmatprep.subr.bf16.mxu0 %v5104_v57  ;;  %3042 = vmatprep.subr.bf16.mxu1 %v5107_v58  ;;  %v5189_v57 = vld [vmem:[#allocation10 + $0x90] ss:$8 sps:$4 sm:$0xff]   ;;  %v5194_v58 = vld [vmem:[#allocation10 + $0xa4] ss:$8 sps:$4 sm:$0xff]  }
 0x24d   :  { %2871 = vmatpush1.bf16.msra.mxu0 %v5102_v59  ;;  %3043 = vmatpush1.bf16.msra.mxu1 %v5105_v60  ;;  %v5192_v59 = vld [vmem:[#allocation10 + $0xa0] ss:$8 sps:$4 sm:$0xff]   ;;  %v5197_v60 = vld [vmem:[#allocation10 + $0xb4] ss:$8 sps:$4 sm:$0xff]  }
 0x24e   :  { %2872 = vmatprep.subr.bf16.mxu0 %v5110_v61  ;;  %3044 = vmatprep.subr.bf16.mxu1 %v5113_v62  ;;  %v5195_v61 = vld [vmem:[#allocation10 + $0xb0] ss:$8 sps:$4 sm:$0xff]   ;;  %v5200_v62 = vld [vmem:[#allocation10 + $0xc4] ss:$8 sps:$4 sm:$0xff]  }
 0x251   :  { %2873 = vmatpush1.bf16.msra.mxu0 %v5108_v63  ;;  %3045 = vmatpush1.bf16.msra.mxu1 %v5111_v1  ;;  %v5198_v63 = vld [vmem:[#allocation10 + $0xc0] ss:$8 sps:$4 sm:$0xff]   ;;  %v5203_v1 = vld [vmem:[#allocation10 + $0xd4] ss:$8 sps:$4 sm:$0xff]  }
 0x252   :  { %2874 = vmatprep.subr.bf16.mxu0 %v5116_v2  ;;  %3046 = vmatprep.subr.bf16.mxu1 %v5119_v3  ;;  %v5201_v2 = vld [vmem:[#allocation10 + $0xd0] ss:$8 sps:$4 sm:$0xff]   ;;  %v5206_v3 = vld [vmem:[#allocation10 + $0xe4] ss:$8 sps:$4 sm:$0xff]  }
 0x255   :  { %2875 = vmatpush1.bf16.msra.mxu0 %v5114_v4  ;;  %3047 = vmatpush1.bf16.msra.mxu1 %v5117_v5  ;;  %v5204_v4 = vld [vmem:[#allocation10 + $0xe0] ss:$8 sps:$4 sm:$0xff]   ;;  %v5209_v5 = vld [vmem:[#allocation10 + $0xf4] ss:$8 sps:$4 sm:$0xff]  }
 0x256   :  { %2876 = vmatprep.subr.bf16.mxu0 %v5122_v6  ;;  %3048 = vmatprep.subr.bf16.mxu1 %v5125_v12  ;;  %v5207_v6 = vld [vmem:[#allocation10 + $0xf0] ss:$8 sps:$4 sm:$0xff]   ;;  %v5212_v12 = vld [vmem:[#allocation10 + $0x104] ss:$8 sps:$4 sm:$0xff]  }
 0x259   :  { %2877 = vmatpush1.bf16.msra.mxu0 %v5120_v13  ;;  %3049 = vmatpush1.bf16.msra.mxu1 %v5123_v14  ;;  %v5258_v13 = vld [vmem:[#allocation11] ss:$8 sps:$4 sm:$0xff]   ;;  %v5260_v14 = vld [vmem:[#allocation11 + $0x4] ss:$8 sps:$4 sm:$0xff]  }
 0x25a   :  { %2878 = vmatprep.subr.bf16.mxu0 %v5128_v15  ;;  %3050 = vmatprep.subr.bf16.mxu1 %v5131_v16  ;;  %v5263_v15 = vld [vmem:[#allocation11 + $0x14] ss:$8 sps:$4 sm:$0xff]   ;;  %v5261_v16 = vld [vmem:[#allocation11 + $0x10] ss:$8 sps:$4 sm:$0xff]  }
 0x25d   :  { %2879 = vmatpush1.bf16.msra.mxu0 %v5126_v17  ;;  %3051 = vmatpush1.bf16.msra.mxu1 %v5129_v18  ;;  %v5266_v17 = vld [vmem:[#allocation11 + $0x24] ss:$8 sps:$4 sm:$0xff]   ;;  %v5264_v18 = vld [vmem:[#allocation11 + $0x20] ss:$8 sps:$4 sm:$0xff]  }
 0x25e   :  { %2880 = vmatprep.subr.bf16.mxu0 %v5134_v19  ;;  %3052 = vmatprep.subr.bf16.mxu1 %v5137_v20  ;;  %v5269_v19 = vld [vmem:[#allocation11 + $0x34] ss:$8 sps:$4 sm:$0xff]   ;;  %v5267_v20 = vld [vmem:[#allocation11 + $0x30] ss:$8 sps:$4 sm:$0xff]  }
 0x261   :  { %2881 = vmatpush1.bf16.msra.mxu0 %v5132_v21  ;;  %3053 = vmatpush1.bf16.msra.mxu1 %v5135_v24  ;;  %v5272_v21 = vld [vmem:[#allocation11 + $0x44] ss:$8 sps:$4 sm:$0xff]   ;;  %v5270_v24 = vld [vmem:[#allocation11 + $0x40] ss:$8 sps:$4 sm:$0xff]  }
 0x262   :  { %2882 = vmatprep.subr.bf16.mxu0 %v5140_v25  ;;  %3054 = vmatprep.subr.bf16.mxu1 %v5143_v27  ;;  %v5275_v25 = vld [vmem:[#allocation11 + $0x54] ss:$8 sps:$4 sm:$0xff]   ;;  %v5273_v27 = vld [vmem:[#allocation11 + $0x50] ss:$8 sps:$4 sm:$0xff]  }
 0x265   :  { %2883 = vmatpush1.bf16.msra.mxu0 %v5138_v28  ;;  %3055 = vmatpush1.bf16.msra.mxu1 %v5141_v0  ;;  %v5278_v28 = vld [vmem:[#allocation11 + $0x64] ss:$8 sps:$4 sm:$0xff]   ;;  %v5276_v0 = vld [vmem:[#allocation11 + $0x60] ss:$8 sps:$4 sm:$0xff]  }
 0x266   :  { %2884 = vmatprep.subr.bf16.mxu0 %v5146_v29  ;;  %3056 = vmatprep.subr.bf16.mxu1 %v5149_v10  ;;  %v5281_v29 = vld [vmem:[#allocation11 + $0x74] ss:$8 sps:$4 sm:$0xff]   ;;  %v5279_v10 = vld [vmem:[#allocation11 + $0x70] ss:$8 sps:$4 sm:$0xff]  }
 0x269   :  { %2885 = vmatpush1.bf16.msra.mxu0 %v5144_v30  ;;  %3057 = vmatpush1.bf16.msra.mxu1 %v5147_v31  ;;  %v5284_v30 = vld [vmem:[#allocation11 + $0x84] ss:$8 sps:$4 sm:$0xff]   ;;  %v5282_v31 = vld [vmem:[#allocation11 + $0x80] ss:$8 sps:$4 sm:$0xff]  }
 0x26a   :  { %2886 = vmatprep.subr.bf16.mxu0 %v5152_v32  ;;  %3058 = vmatprep.subr.bf16.mxu1 %v5155_v55  ;;  %v5287_v32 = vld [vmem:[#allocation11 + $0x94] ss:$8 sps:$4 sm:$0xff]   ;;  %v5285_v55 = vld [vmem:[#allocation11 + $0x90] ss:$8 sps:$4 sm:$0xff]  }
 0x26d   :  { %2887 = vmatpush1.bf16.msra.mxu0 %v5150_v33  ;;  %3059 = vmatpush1.bf16.msra.mxu1 %v5153_v34  ;;  %v5290_v33 = vld [vmem:[#allocation11 + $0xa4] ss:$8 sps:$4 sm:$0xff]   ;;  %v5288_v34 = vld [vmem:[#allocation11 + $0xa0] ss:$8 sps:$4 sm:$0xff]  }
 0x26e   :  { %2888 = vmatprep.subr.bf16.mxu0 %v5158_v35  ;;  %3060 = vmatprep.subr.bf16.mxu1 %v5161_v36  ;;  %v5293_v35 = vld [vmem:[#allocation11 + $0xb4] ss:$8 sps:$4 sm:$0xff]   ;;  %v5291_v36 = vld [vmem:[#allocation11 + $0xb0] ss:$8 sps:$4 sm:$0xff]  }
 0x271   :  { %2889 = vmatpush1.bf16.msra.mxu0 %v5156_v37  ;;  %3061 = vmatpush1.bf16.msra.mxu1 %v5159_v38  ;;  %v5296_v37 = vld [vmem:[#allocation11 + $0xc4] ss:$8 sps:$4 sm:$0xff]   ;;  %v1427_v38 = vld [vmem:[%s5859_s4] sm:$0xf] }
 0x272   :  { %3481 = vmatprep.subr.bf16.mxu0 %v5164_v41  ;;  %3777 = vmatprep.subr.bf16.mxu1 %v5260_v14  ;;  %v5294_v41 = vld [vmem:[#allocation11 + $0xc0] ss:$8 sps:$4 sm:$0xff]   ;;  %v5213_v14 = vld [vmem:[#allocation10 + $0x110] ss:$8 sps:$4 sm:$0xff]  }
 0x274   :  { %2891 = vmatmul.mubr.bf16.vlgmr.msra.gmra.mrb[8].mxu0 %v5802_v39  ;;  %3063 = vmatmul.mubr.bf16.vlgmr.msra.gmra.mrb[8].mxu1 %v5802_v39  ;;  %v5182_v39 = vld [vmem:[#allocation10 + $0x64] ss:$8 sps:$4 sm:$0xff]  }
 0x275   :  { %3482 = vmatpush1.bf16.msra.mxu0 %v5162_v42  ;;  %3778 = vmatpush1.bf16.msra.mxu1 %v5258_v13  ;;  %v5299_v42 = vld [vmem:[#allocation11 + $0xd4] ss:$8 sps:$4 sm:$0xff]  }
 0x276   :  { %3483 = vmatprep.subr.bf16.mxu0 %v5167_v43  ;;  %3779 = vmatprep.subr.bf16.mxu1 %v5263_v15  ;;  %v1432_v43 = vrot.slane %v1427_v38, %v5769_v9  ;;  %v5215_v13 = vld [vmem:[#allocation10 + $0x114] ss:$8 sps:$4 sm:$0xff]   ;;  %v5218_v15 = vld [vmem:[#allocation10 + $0x124] ss:$8 sps:$4 sm:$0xff]  }
 0x279   :  { %3484 = vmatpush1.bf16.msra.mxu0 %v5165_v44  ;;  %3780 = vmatpush1.bf16.msra.mxu1 %v5261_v16  ;;  %v1440_v44 = vrot.slane %v1427_v38, %v295_v23  ;;  %v5216_v16 = vld [vmem:[#allocation10 + $0x120] ss:$8 sps:$4 sm:$0xff]  }
 0x27a   :  { %3485 = vmatprep.subr.bf16.mxu0 %v5170_v45  ;;  %3781 = vmatprep.subr.bf16.mxu1 %v5266_v17  ;;  %v1436_v45 = vrot.slane %v1427_v38, %v5774_v11  ;;  %v5221_v17 = vld [vmem:[#allocation10 + $0x134] ss:$8 sps:$4 sm:$0xff]  }
 0x27d   :  { %3486 = vmatpush1.bf16.msra.mxu0 %v5168_v46  ;;  %3782 = vmatpush1.bf16.msra.mxu1 %v5264_v18  ;;  %v1444_v46 = vrot.slane %v1427_v38, %v299_v26  ;;  %v5219_v18 = vld [vmem:[#allocation10 + $0x130] ss:$8 sps:$4 sm:$0xff]  }
 0x27e   :  { %3487 = vmatprep.subr.bf16.mxu0 %v5173_v47  ;;  %3783 = vmatprep.subr.bf16.mxu1 %v5269_v19  ;;  %v5297_v47 = vld [vmem:[#allocation11 + $0xd0] ss:$8 sps:$4 sm:$0xff]   ;;  %v5224_v19 = vld [vmem:[#allocation10 + $0x144] ss:$8 sps:$4 sm:$0xff]  }
 0x27f   :  { %v5249_v38 = vld [vmem:[#allocation10 + $0x1d0] ss:$8 sps:$4 sm:$0xff]  }
 0x281   :  { %3488 = vmatpush1.bf16.msra.mxu0 %v5171_v7  ;;  %3784 = vmatpush1.bf16.msra.mxu1 %v5267_v20  ;;  %v5222_v20 = vld [vmem:[#allocation10 + $0x140] ss:$8 sps:$4 sm:$0xff]  }
 0x282   :  { %3489 = vmatprep.subr.bf16.mxu0 %v5176_v22  ;;  %3785 = vmatprep.subr.bf16.mxu1 %v5272_v21  ;;  %v5227_v21 = vld [vmem:[#allocation10 + $0x154] ss:$8 sps:$4 sm:$0xff]  }
 0x285   :  { %3490 = vmatpush1.bf16.msra.mxu0 %v5174_v48  ;;  %3786 = vmatpush1.bf16.msra.mxu1 %v5270_v24  ;;  %v5225_v24 = vld [vmem:[#allocation10 + $0x150] ss:$8 sps:$4 sm:$0xff]  }
 0x286   :  { %3491 = vmatprep.subr.bf16.mxu0 %v5179_v49  ;;  %3787 = vmatprep.subr.bf16.mxu1 %v5275_v25  ;;  %v5230_v25 = vld [vmem:[#allocation10 + $0x164] ss:$8 sps:$4 sm:$0xff]  }
 0x289   :  { %3492 = vmatpush1.bf16.msra.mxu0 %v5177_v50  ;;  %3788 = vmatpush1.bf16.msra.mxu1 %v5273_v27  ;;  %v5228_v27 = vld [vmem:[#allocation10 + $0x160] ss:$8 sps:$4 sm:$0xff]  }
 0x28a   :  { %3493 = vmatprep.subr.bf16.mxu0 %v5182_v39  ;;  %3789 = vmatprep.subr.bf16.mxu1 %v5278_v28  ;;  %v5233_v28 = vld [vmem:[#allocation10 + $0x174] ss:$8 sps:$4 sm:$0xff]  }
 0x28d   :  { %3494 = vmatpush1.bf16.msra.mxu0 %v5180_v51  ;;  %3790 = vmatpush1.bf16.msra.mxu1 %v5276_v0  ;;  %v5231_v0 = vld [vmem:[#allocation10 + $0x170] ss:$8 sps:$4 sm:$0xff]  }
 0x28e   :  { %3495 = vmatprep.subr.bf16.mxu0 %v5185_v40  ;;  %3791 = vmatprep.subr.bf16.mxu1 %v5281_v29  ;;  %v5236_v29 = vld [vmem:[#allocation10 + $0x184] ss:$8 sps:$4 sm:$0xff]  }
 0x291   :  { %3496 = vmatpush1.bf16.msra.mxu0 %v5183_v52  ;;  %3792 = vmatpush1.bf16.msra.mxu1 %v5279_v10  ;;  %v5234_v10 = vld [vmem:[#allocation10 + $0x180] ss:$8 sps:$4 sm:$0xff]  }
 0x292   :  { %3497 = vmatprep.subr.bf16.mxu0 %v5188_v53  ;;  %3793 = vmatprep.subr.bf16.mxu1 %v5284_v30  ;;  %v5239_v30 = vld [vmem:[#allocation10 + $0x194] ss:$8 sps:$4 sm:$0xff]  }
 0x295   :  { %3498 = vmatpush1.bf16.msra.mxu0 %v5186_v54  ;;  %3794 = vmatpush1.bf16.msra.mxu1 %v5282_v31  ;;  %v5237_v31 = vld [vmem:[#allocation10 + $0x190] ss:$8 sps:$4 sm:$0xff]  }
 0x296   :  { %3499 = vmatprep.subr.bf16.mxu0 %v5191_v56  ;;  %3795 = vmatprep.subr.bf16.mxu1 %v5287_v32  ;;  %v5242_v32 = vld [vmem:[#allocation10 + $0x1a4] ss:$8 sps:$4 sm:$0xff]  }
 0x299   :  { %3500 = vmatpush1.bf16.msra.mxu0 %v5189_v57  ;;  %3796 = vmatpush1.bf16.msra.mxu1 %v5285_v55  ;;  %v5240_v55 = vld [vmem:[#allocation10 + $0x1a0] ss:$8 sps:$4 sm:$0xff]  }
 0x29a   :  { %3501 = vmatprep.subr.bf16.mxu0 %v5194_v58  ;;  %3797 = vmatprep.subr.bf16.mxu1 %v5290_v33  ;;  %v5245_v33 = vld [vmem:[#allocation10 + $0x1b4] ss:$8 sps:$4 sm:$0xff]  }
 0x29d   :  { %3502 = vmatpush1.bf16.msra.mxu0 %v5192_v59  ;;  %3798 = vmatpush1.bf16.msra.mxu1 %v5288_v34  ;;  %v5243_v34 = vld [vmem:[#allocation10 + $0x1b0] ss:$8 sps:$4 sm:$0xff]  }
 0x29e   :  { %3503 = vmatprep.subr.bf16.mxu0 %v5197_v60  ;;  %3799 = vmatprep.subr.bf16.mxu1 %v5293_v35  ;;  %v5248_v35 = vld [vmem:[#allocation10 + $0x1c4] ss:$8 sps:$4 sm:$0xff]  }
 0x2a1   :  { %3504 = vmatpush1.bf16.msra.mxu0 %v5195_v61  ;;  %3800 = vmatpush1.bf16.msra.mxu1 %v5291_v36  ;;  %v5246_v36 = vld [vmem:[#allocation10 + $0x1c0] ss:$8 sps:$4 sm:$0xff]  }
 0x2a2   :  { %3505 = vmatprep.subr.bf16.mxu0 %v5200_v62  ;;  %3801 = vmatprep.subr.bf16.mxu1 %v5296_v37  ;;  %v5251_v37 = vld [vmem:[#allocation10 + $0x1d4] ss:$8 sps:$4 sm:$0xff]  }
 0x2a5   :  { %3506 = vmatpush1.bf16.msra.mxu0 %v5198_v63  ;;  %3802 = vmatpush1.bf16.msra.mxu1 %v5294_v41  ;;  %v5254_v41 = vld [vmem:[#allocation10 + $0x1e4] ss:$8 sps:$4 sm:$0xff]  }
 0x2a6   :  { %3507 = vmatprep.subr.bf16.mxu0 %v5203_v1  ;;  %3803 = vmatprep.subr.bf16.mxu1 %v5299_v42  ;;  %v5252_v42 = vld [vmem:[#allocation10 + $0x1e0] ss:$8 sps:$4 sm:$0xff]  }
 0x2a9   :  { %3508 = vmatpush1.bf16.msra.mxu0 %v5201_v2  ;;  %3804 = vmatpush1.bf16.msra.mxu1 %v5297_v47  ;;  %v5305_v47 = vld [vmem:[#allocation11 + $0xf4] ss:$8 sps:$4 sm:$0xff]  }
 0x2aa   :  { %3509 = vmatprep.subr.bf16.mxu0 %v5206_v3 }
 0x2ad   :  { %3510 = vmatpush1.bf16.msra.mxu0 %v5204_v4 }
 0x2ae   :  { %3511 = vmatprep.subr.bf16.mxu0 %v5209_v5 }
 0x2b1   :  { %3512 = vmatpush1.bf16.msra.mxu0 %v5207_v6 }
 0x2b2   :  { %3524 = vmatprep.subr.bf16.mxu0 %v5212_v12  ;;  %v5210_v12 = vld [vmem:[#allocation10 + $0x100] ss:$8 sps:$4 sm:$0xff]  }
 0x347   :  { %v2892_v7 = vpop.f32.mrb[8].mxu0  ;;  %v3064_v22 = vpop.f32.mrb[8].mxu1 }
 0x348   :  { %v4716_v48 = vadd.f32 %v2892_v7, %v1432_v43  ;;  %v4720_v49 = vadd.f32 %v3064_v22, %v1440_v44  ;;  %v2894_v50 = vpop.f32.mrb[9].mxu0  ;;  %v3066_v39 = vpop.f32.mrb[9].mxu1  ;;  %v5303_v7 = vld [vmem:[#allocation11 + $0xf0] ss:$8 sps:$4 sm:$0xff]   ;;  %v5306_v22 = vld [vmem:[#allocation13 + $0x40] sm:$0xff]  }
 0x349   :  { %v4717_v51 = vadd.f32 %v2894_v50, %v1436_v45  ;;  %v4721_v40 = vadd.f32 %v3066_v39, %v1444_v46  ;;  %v2896_v52 = vpop.f32.mrb[10].mxu0  ;;  %v3068_v53 = vpop.f32.mrb[10].mxu1 }
 0x34a   :  { %v4718_v23 = vadd.f32 %v2896_v52, %v1432_v43  ;;  %v4722_v54 = vadd.f32 %v3068_v53, %v1440_v44  ;;  %v2898_v56 = vpop.f32.mrb[11].mxu0  ;;  %v3070_v57 = vpop.f32.mrb[11].mxu1  ;;  %v3073_v58 = vmax.f32 %v4716_v48, 0.0  ;;  %v3075_v59 = vmax.f32 %v4720_v49, 0.0  ;;  %v5257_v43 = vld [vmem:[#allocation10 + $0x1f4] ss:$8 sps:$4 sm:$0xff]  }
 0x34b   :  { %v4719_v8 = vadd.f32 %v2898_v56, %v1436_v45  ;;  %v4723_v26 = vadd.f32 %v3070_v57, %v1444_v46  ;;  %v3074_v62 = vmax.f32 %v4717_v51, 0.0  ;;  %v3076_v63 = vmax.f32 %v4721_v40, 0.0  ;;  %v5255_v44 = vld [vmem:[#allocation10 + $0x1f0] ss:$8 sps:$4 sm:$0xff]   ;;  %v5302_v45 = vld [vmem:[#allocation11 + $0xe4] ss:$8 sps:$4 sm:$0xff]  }
 0x34c   :  { %v3077_v60 = vmax.f32 %v4718_v23, 0.0  ;;  %v3079_v61 = vmax.f32 %v4722_v54, 0.0  ;;  %v5300_v46 = vld [vmem:[#allocation11 + $0xe0] ss:$8 sps:$4 sm:$0xff]   ;;  %3805 = vmatprep.subr.bf16.mxu1 %v5302_v45 }
 0x34d   :  { %v3078_v1 = vmax.f32 %v4719_v8, 0.0  ;;  %v3080_v2 = vmax.f32 %v4723_v26, 0.0  ;;  %3806 = vmatpush1.bf16.msra.mxu1 %v5300_v46  ;;  %v3149_v48 = vld [vmem:[%s5861_s6] sm:$0x3] }
 0x34e   :  { %v3081_v3 = vpack.c.bf16 %v3077_v60, %v3073_v58  ;;  %v5821_v4 = vpack.c.bf16 %v3079_v61, %v3075_v59  ;;  %3807 = vmatprep.subr.bf16.mxu1 %v5305_v47  ;;  %v3154_v49 = vrot.slane %v3149_v48, %v5769_v9  ;;  %v3158_v50 = vrot.slane %v3149_v48, %v5774_v11  ;;  %v5307_v61 = vld [vmem:[#allocation13] sm:$0xff]   ;;  %v4630_v45 = vld [vmem:[%s5865_s10] ss:$0 sm:$0xff]  ;;  %s4132_s10 = sshll.u32 %s5558_s20, 4  ;;  %s4133_s10 = int_to_ptr.vmem [resolvable:$true] %s4132_s10 }
 0x34f   :  { %v3082_v5 = vpack.c.bf16 %v3078_v1, %v3074_v62  ;;  %v3084_v6 = vpack.c.bf16 %v3080_v2, %v3076_v63  ;;  %v5308_v62 = vld [vmem:[#allocation13 + $0x48] sm:$0xff]   ;;  %v5310_v1 = vld [vmem:[#allocation13 + $0x50] sm:$0xff]   ;;  %s5506_s22 = scalar_lea.vmem %s4133_s10, 128  ;;  %p5511_p9 = scmp.lt.s32.totalorder %s4133_s10, %s4133_s10 }
 0x350   :  { %v5309_v63 = vld [vmem:[#allocation13 + $0x8] sm:$0xff]   ;;  %v5311_v2 = vld [vmem:[#allocation13 + $0x10] sm:$0xff]   ;;  %p5507_p8 = scmp.ne.s32.totalorder %s4133_s10, %s5506_s22  ;;  %p5512_p10 = scmp.lt.s32.totalorder %s5506_s22, %s5506_s22 }
 0x351   :  { %3513 = vmatprep.mubr.bf16.mxu0 %v3082_v5  ;;  %3808 = vmatpush1.bf16.msra.mxu1 %v5303_v7  ;;  %v5314_v5 = vld [vmem:[#allocation13 + $0x60] sm:$0xff]  }
 0x352   :  { %3514 = vmatmul.mubr.bf16.vlgmr.msra.gmra.mrb[12].mxu0 %v3081_v3  ;;  %4665 = vmatprep.subr.bf16.mxu1 %v5306_v22  ;;  %v5312_v3 = vld [vmem:[#allocation13 + $0x58] sm:$0xff]   ;;  %p5513_p11 = por %p5512_p10, %p5511_p9 }
 0x353   :  { %3525 = vmatpush1.bf16.msra.mxu0 %v5210_v12  ;;  %3556 = vmatprep.mubr.bf16.mxu0 %v3084_v6  ;;  %v5315_v6 = vld [vmem:[#allocation13 + $0x20] sm:$0xff]   ;;  %v5316_v12 = vld [vmem:[#allocation13 + $0x68] sm:$0xff]  }
 0x354   :  { %3526 = vmatprep.subr.bf16.mxu0 %v5215_v13  ;;  %v5317_v13 = vld [vmem:[#allocation13 + $0x28] sm:$0xff]   ;;  %p5514_p12 = pnand %p5513_p11, %p5507_p8 }
 0x357   :  { %3527 = vmatpush1.bf16.msra.mxu0 %v5213_v14  ;;  %v5318_v14 = vld [vmem:[#allocation13 + $0x70] sm:$0xff]  }
 0x358   :  { %3528 = vmatprep.subr.bf16.mxu0 %v5218_v15  ;;  %v5319_v15 = vld [vmem:[#allocation13 + $0x30] sm:$0xff]  }
 0x35b   :  { %3529 = vmatpush1.bf16.msra.mxu0 %v5216_v16  ;;  %v5320_v16 = vld [vmem:[#allocation13 + $0x78] sm:$0xff]  }
 0x35c   :  { %3530 = vmatprep.subr.bf16.mxu0 %v5221_v17  ;;  %v5321_v17 = vld [vmem:[#allocation13 + $0x38] sm:$0xff]  }
 0x35f   :  { %3531 = vmatpush1.bf16.msra.mxu0 %v5219_v18  ;;  %v5556_v18 = vmov 0.0  }
 0x360   :  { %3532 = vmatprep.subr.bf16.mxu0 %v5224_v19  ;;  %v3605_v19 = vld [vmem:[%s5863_s8] sm:$0x3] }
 0x363   :  { %3533 = vmatpush1.bf16.msra.mxu0 %v5222_v20  ;;  %v3610_v20 = vrot.slane %v3605_v19, %v5769_v9  ;;  %v5323_v9 = vld [vmem:[#allocation14 + $0x8] sm:$0xff]  }
 0x364   :  { %3534 = vmatprep.subr.bf16.mxu0 %v5227_v21  ;;  %v3614_v21 = vrot.slane %v3605_v19, %v5774_v11  ;;  %v5324_v11 = vld [vmem:[#allocation14 + $0x10] sm:$0xff]  }
 0x367   :  { %3535 = vmatpush1.bf16.msra.mxu0 %v5225_v24 }
 0x368   :  { %3536 = vmatprep.subr.bf16.mxu0 %v5230_v25 }
 0x36b   :  { %3537 = vmatpush1.bf16.msra.mxu0 %v5228_v27 }
 0x36c   :  { %3538 = vmatprep.subr.bf16.mxu0 %v5233_v28 }
 0x36f   :  { %3539 = vmatpush1.bf16.msra.mxu0 %v5231_v0 }
 0x370   :  { %3540 = vmatprep.subr.bf16.mxu0 %v5236_v29 }
 0x373   :  { %3541 = vmatpush1.bf16.msra.mxu0 %v5234_v10 }
 0x374   :  { %3542 = vmatprep.subr.bf16.mxu0 %v5239_v30 }
 0x377   :  { %3543 = vmatpush1.bf16.msra.mxu0 %v5237_v31 }
 0x378   :  { %3544 = vmatprep.subr.bf16.mxu0 %v5242_v32 }
 0x37b   :  { %3545 = vmatpush1.bf16.msra.mxu0 %v5240_v55 }
 0x37c   :  { %3546 = vmatprep.subr.bf16.mxu0 %v5245_v33 }
 0x37f   :  { %3547 = vmatpush1.bf16.msra.mxu0 %v5243_v34 }
 0x380   :  { %3548 = vmatprep.subr.bf16.mxu0 %v5248_v35 }
 0x383   :  { %3549 = vmatpush1.bf16.msra.mxu0 %v5246_v36  ;;  %v5322_v36 = vld [vmem:[#allocation14] sm:$0xff]  }
 0x384   :  { %3550 = vmatprep.subr.bf16.mxu0 %v5251_v37  ;;  %v5325_v37 = vld [vmem:[#allocation14 + $0x18] sm:$0xff]  }
 0x387   :  { %3551 = vmatpush1.bf16.msra.mxu0 %v5249_v38  ;;  %v5326_v38 = vld [vmem:[#allocation14 + $0x20] sm:$0xff]  }
 0x388   :  { %3552 = vmatprep.subr.bf16.mxu0 %v5254_v41  ;;  %v5327_v41 = vld [vmem:[#allocation14 + $0x28] sm:$0xff]  }
 0x38b   :  { %3553 = vmatpush1.bf16.msra.mxu0 %v5252_v42  ;;  %v5328_v42 = vld [vmem:[#allocation14 + $0x30] sm:$0xff]  }
 0x38c   :  { %3554 = vmatprep.subr.bf16.mxu0 %v5257_v43  ;;  %v5329_v43 = vld [vmem:[#allocation14 + $0x38] sm:$0xff]  }
 0x38f   :  { %3555 = vmatpush1.bf16.msra.mxu0 %v5255_v44 }
 0x392   :  { %3557 = vmatmul.mubr.bf16.vlgmr.msra.gmra.mrb[12].mxu0 %v5821_v4  ;;  %v5313_v4 = vld [vmem:[#allocation13 + $0x18] sm:$0xff]  }
 0x465   :  { %v3558_v39 = vpop.f32.mrb[12].mxu0 }
 0x466   :  { %v4724_v51 = vadd.f32 %v3558_v39, %v3154_v49  ;;  %v3560_v40 = vpop.f32.mrb[13].mxu0 }
 0x467   :  { %v4725_v52 = vadd.f32 %v3560_v40, %v3158_v50  ;;  %v3562_v53 = vpop.f32.mrb[14].mxu0 }
 0x468   :  { %v4726_v23 = vadd.f32 %v3562_v53, %v3154_v49  ;;  %v3564_v54 = vpop.f32.mrb[15].mxu0  ;;  %v3567_v57 = vmax.f32 %v4724_v51, 0.0 }
 0x469   :  { %v4727_v56 = vadd.f32 %v3564_v54, %v3158_v50  ;;  %v3568_v26 = vmax.f32 %v4725_v52, 0.0  ;;  %v4647_v52 = vld [vmem:[%s5867_s12] ss:$0 sm:$0xff] }
 0x46a   :  { %v3569_v8 = vmax.f32 %v4726_v23, 0.0 }
 0x46b   :  { %v3570_v58 = vmax.f32 %v4727_v56, 0.0 }
 0x46c   :  { %v3571_v59 = vpack.c.bf16 %v3569_v8, %v3567_v57 }
 0x46d   :  { %v3572_v60 = vpack.c.bf16 %v3570_v58, %v3568_v26 }
 0x46f   :  { %3809 = vmatprep.mubr.bf16.mxu1 %v3572_v60 }
 0x470   :  { %3810 = vmatmul.mubr.bf16.vlgmr.msra.gmra.mrb[12].mxu1 %v3571_v59 }
 0x471   :  { %4666 = vmatpush3.bf16.msra.mxu1 %v5307_v61 }
 0x472   :  { %4667 = vmatprep.subr.bf16.mxu1 %v5308_v62 }
 0x475   :  { %4668 = vmatpush3.bf16.msra.mxu1 %v5309_v63 }
 0x476   :  { %4669 = vmatprep.subr.bf16.mxu1 %v5310_v1 }
 0x479   :  { %4670 = vmatpush3.bf16.msra.mxu1 %v5311_v2 }
 0x47a   :  { %4671 = vmatprep.subr.bf16.mxu1 %v5312_v3 }
 0x47d   :  { %4672 = vmatpush3.bf16.msra.mxu1 %v5313_v4 }
 0x47e   :  { %4673 = vmatprep.subr.bf16.mxu1 %v5314_v5 }
 0x481   :  { %4674 = vmatpush3.bf16.msra.mxu1 %v5315_v6 }
 0x482   :  { %4675 = vmatprep.subr.bf16.mxu1 %v5316_v12 }
 0x485   :  { %4676 = vmatpush3.bf16.msra.mxu1 %v5317_v13 }
 0x486   :  { %4677 = vmatprep.subr.bf16.mxu1 %v5318_v14 }
 0x489   :  { %4678 = vmatpush3.bf16.msra.mxu1 %v5319_v15 }
 0x48a   :  { %4679 = vmatprep.subr.bf16.mxu1 %v5320_v16 }
 0x48d   :  { %4680 = vmatpush3.bf16.msra.mxu1 %v5321_v17 }
 0x48e   :  { %4696 = vmatprep.subr.bf16.mxu1 %v5556_v18 }
 0x543   :  { %v3811_v24 = vpop.f32.mrb[12].mxu1 }
 0x544   :  { %v3812_v25 = vadd.f32 %v3811_v24, %v3610_v20  ;;  %v3813_v27 = vpop.f32.mrb[13].mxu1 }
 0x545   :  { %v3814_v28 = vadd.f32 %v3813_v27, %v3614_v21  ;;  %v3815_v0 = vpop.f32.mrb[14].mxu1 }
 0x546   :  { %v3816_v29 = vadd.f32 %v3815_v0, %v3610_v20  ;;  %v3817_v10 = vpop.f32.mrb[15].mxu1  ;;  %v3820_v31 = vmax.f32 %v3812_v25, 0.0 }
 0x547   :  { %v3818_v30 = vadd.f32 %v3817_v10, %v3614_v21  ;;  %v3821_v55 = vmax.f32 %v3814_v28, 0.0 }
 0x548   :  { %v3822_v32 = vmax.f32 %v3816_v29, 0.0 }
 0x549   :  { %v3823_v33 = vmax.f32 %v3818_v30, 0.0 }
 0x54a   :  { %v3824_v34 = vpack.c.bf16 %v3822_v32, %v3820_v31 }
 0x54b   :  { %v3825_v35 = vpack.c.bf16 %v3823_v33, %v3821_v55 }
 0x54d   :  { %3993 = vmatprep.mubr.bf16.mxu1 %v3825_v35 }
 0x54e   :  { %3994 = vmatmul.mubr.bf16.vlgmr.msra.gmra.mrb[16].mxu1 %v3824_v34 }
 0x54f   :  { %4697 = vmatpush3.bf16.msra.mxu1 %v5322_v36  ;;  %4712 = vmatprep.mubr.msk.bf16.mxu1 %vm5557_vm0, %v5556_v18 }
 0x550   :  { %4698 = vmatprep.subr.bf16.mxu1 %v5556_v18 }
 0x553   :  { %4699 = vmatpush3.bf16.msra.mxu1 %v5323_v9 }
 0x554   :  { %4700 = vmatprep.subr.bf16.mxu1 %v5556_v18 }
 0x557   :  { %4701 = vmatpush3.bf16.msra.mxu1 %v5324_v11 }
 0x558   :  { %4702 = vmatprep.subr.bf16.mxu1 %v5556_v18 }
 0x55b   :  { %4703 = vmatpush3.bf16.msra.mxu1 %v5325_v37 }
 0x55c   :  { %4704 = vmatprep.subr.bf16.mxu1 %v5556_v18 }
 0x55f   :  { %4705 = vmatpush3.bf16.msra.mxu1 %v5326_v38 }
 0x560   :  { %4706 = vmatprep.subr.bf16.mxu1 %v5556_v18 }
 0x563   :  { %4707 = vmatpush3.bf16.msra.mxu1 %v5327_v41 }
 0x564   :  { %4708 = vmatprep.subr.bf16.mxu1 %v5556_v18 }
 0x567   :  { %4709 = vmatpush3.bf16.msra.mxu1 %v5328_v42 }
 0x568   :  { %4710 = vmatprep.subr.bf16.mxu1 %v5556_v18 }
 0x56b   :  { %4711 = vmatpush3.bf16.msra.mxu1 %v5329_v43 }
 0x621   :  { %v4681_v44 = vpop.f32.mrb[16].mxu1 }
 0x622   :  { %v4682_v46 = vpop.f32.mrb[17].mxu1 }
 0x623   :  { %v4683_v47 = vadd.f32 %v4682_v46, %v4681_v44  ;;  %v4684_v7 = vpop.f32.mrb[18].mxu1 }
 0x624   :  { %v4685_v22 = vpop.f32.mrb[19].mxu1 }
 0x625   :  { %v3996_v48 = vadd.f32 %v4683_v47, %v4630_v45  ;;  %v4686_v49 = vadd.f32 %v4685_v22, %v4684_v7 }
 0x627   :  { %v3999_v50 = vadd.f32 %v4686_v49, %v4630_v45  ;;  %v4002_v39 = vmax.f32 %v3996_v48, 0.0 }
 0x629   :  { %v4003_v51 = vmax.f32 %v3999_v50, 0.0 }
 0x62b   :  { %v4004_v40 = vpack.c.bf16 %v4003_v51, %v4002_v39 }
 0x62d   :  { %4713 = vmatmul.mubr.bf16.vlgmr.msra.gmra.mrb[20].mxu1 %v4004_v40 }
 0x700   :  { %v4110_v53 = vpop.f32.mrb[20].mxu1 }
 0x701   :  { %v4714_v23 = vpop.f32.mrb[21].mxu1  ;;  %v4111_v56 = vadd.f32 %v4647_v52, %v4110_v53 }
 0x702   :  { %v4113_v54 = vpop.f32.mrb[22].mxu1 }
 0x703   :  { %v4114_v57 = vadd.f32 %v4647_v52, %v4113_v54  ;;  %v4715_v8 = vpop.f32.mrb[23].mxu1 }
 0x705   :  { %v4663_v26 = vpack.c.bf16 %v4114_v57, %v4111_v56 }
 0x707   :  { %4664 = vst [vmem:[#allocation16] sm:$0xff] %v4663_v26  }
 0x708   :  { %5517 = shalt.err (!%p5514_p12)
}
 0x709   :  { %s5518_s30 = scalar_lea.hbm %s5868_s13, 128 }
 0x70a   :  { %p5519_p13 = scmp.ne.s32.totalorder %s5868_s13, %s5518_s30  ;;  %p5522_p0 = scmp.lt.u32.totalorder %s5518_s30, %s5868_s13 }
 0x70c   :  { %p5524_p1 = pnand %p5522_p0, %p5519_p13 }
 0x70e   :  { %5527 = shalt.err (!%p5524_p1)
}
 0x70f   :  { %4138 = dma.vmem_to_hbm [thread:$0]  %s4133_s10, 128, %s5868_s13, [#allocation4], %s5553_s5, %s5553_s5, %s5554_s23  }
 0x710   :  { %5538 = dma.done.wait [#allocation4], 128  }
 0x711   :  { %5539 = vsyncadd [#allocation4], 4294967168 }
 0x712   :  { %4142 = vsyncpa [#allocation3], 1 }
 0x713   :  { %4143 = vsyncpa [#allocation6], 1 }
 0x714   :  { %4144 = vsyncpa [#allocation9], 1 }
 0x715   :  { %4145 = vsyncpa [#allocation12], 1 }
 0x716   :  { %4146 = vsyncpa [#allocation15], 1 }
 0x717   :  { %4147 = vsyncpa [#allocation4], 1 }

</bundles_post_ra>
